<compile_context>
chip_gen: v7x
topology: tpu7x:2x2x1
jax: 0.10.0
libtpu: 0.0.40
codegen_flags: <defaults>
</compile_context>

<pallas_src>
import functools

import jax
import jax.numpy as jnp
import numpy as np
from jax import lax
from jax.experimental import pallas as pl
from jax.experimental.pallas import tpu as pltpu


# ------------------------------ Pallas kernel ------------------------------- #

def _decoder_fused_kernel(x_ref, skip_ref, bup_ref, biasu_ref,
                          b1_ref, bias1_ref, b2_ref, bias2_ref,
                          o_ref, h1e, h1o, h2e, h2o, *, h_in, wu):
    """Fused ConvTranspose2d(k=2,s=2) + concat + 2x (Conv3x3 + BN + ReLU).

    One image per grid step.  Activations are kept as two row-parity planes
    (even output rows / odd output rows) in flattened NHWC "W*C" columns with a
    one-row zero halo at top/bottom of each plane for the 3x3 conv.

      x_ref    : (1, H_in, W_in*C_in)  bf16  input rows
      skip_ref : (1, H_in, 2*wu)       bf16  [skip row 2p | skip row 2p+1]
      bup_ref  : (W_in*C_in, 2*wu)     bf16  deconv -> [even-row up | odd-row up]
      biasu_ref: (1, 2*wu)             f32
      b1_ref   : (3, 2*wu, wu)         bf16  conv1 band per kh (blocked concat rows)
      b2_ref   : (3, wu, wu)           bf16  conv2 band per kh
      bias*_ref: (1, wu)               f32   conv bias + BN shift per pixel
      o_ref    : (1, 2*H_in, wu)       f32   rows [0:H_in) even, [H_in:2H_in) odd
      h1e/h1o  : (H_in+2, 2*wu)        bf16  concat planes (+ zero halo rows)
      h2e/h2o  : (H_in+2, wu)          bf16  conv1 output planes (+ zero halo rows)
    """
    hi = h_in
    l1 = 2 * wu
    bf = jnp.bfloat16

    # --- Stage 1: ConvTranspose2d(k=2, s=2); concat happens purely by layout. ---
    up = jnp.dot(x_ref[0], bup_ref[...], preferred_element_type=jnp.float32)
    up = (up + biasu_ref[...]).astype(bf)          # (hi, 2*wu): [even rows | odd rows]
    sk = skip_ref[0]                               # (hi, 2*wu): [even rows | odd rows]

    z1 = jnp.zeros((1, l1), bf)
    h1e[0:1, :] = z1
    h1e[hi + 1:hi + 2, :] = z1
    h1o[0:1, :] = z1
    h1o[hi + 1:hi + 2, :] = z1
    h1e[1:hi + 1, 0:wu] = up[:, 0:wu]              # up channels   (concat block 0)
    h1o[1:hi + 1, 0:wu] = up[:, wu:l1]
    h1e[1:hi + 1, wu:l1] = sk[:, 0:wu]             # skip channels (concat block 1)
    h1o[1:hi + 1, wu:l1] = sk[:, wu:l1]

    def conv3x3_bn_relu(e_scr, o_scr, b_ref, bias_ref):
        # Activation row r lives in plane (r % 2) at scratch sublane (r // 2) + 1.
        # Even output row 2p   needs rows (2p-1, 2p,   2p+1) -> (O[p-1], E[p], O[p]).
        # Odd  output row 2p+1 needs rows (2p,   2p+1, 2p+2) -> (E[p],   O[p], E[p+1]).
        # NOTE: the sublane-shifted scratch slices may relayout; tiny slabs here
        # (see review) so accepted.
        b0, b1, b2 = b_ref[0], b_ref[1], b_ref[2]
        bias = bias_ref[...]
        e_mid = e_scr[1:hi + 1, :]
        o_mid = o_scr[1:hi + 1, :]
        ae = jnp.dot(o_scr[0:hi, :], b0, preferred_element_type=jnp.float32)
        ae += jnp.dot(e_mid, b1, preferred_element_type=jnp.float32)
        ae += jnp.dot(o_mid, b2, preferred_element_type=jnp.float32)
        ao = jnp.dot(e_mid, b0, preferred_element_type=jnp.float32)
        ao += jnp.dot(o_mid, b1, preferred_element_type=jnp.float32)
        ao += jnp.dot(e_scr[2:hi + 2, :], b2, preferred_element_type=jnp.float32)
        return jnp.maximum(ae + bias, 0.0), jnp.maximum(ao + bias, 0.0)

    # --- Stage 2: Conv3x3 + BN + ReLU (layer 1) -> h2 planes ---
    a1e, a1o = conv3x3_bn_relu(h1e, h1o, b1_ref, bias1_ref)
    z2 = jnp.zeros((1, wu), bf)
    h2e[0:1, :] = z2
    h2e[hi + 1:hi + 2, :] = z2
    h2o[0:1, :] = z2
    h2o[hi + 1:hi + 2, :] = z2
    h2e[1:hi + 1, :] = a1e.astype(bf)
    h2o[1:hi + 1, :] = a1o.astype(bf)

    # --- Stage 3: Conv3x3 + BN + ReLU (layer 2) -> output ---
    a2e, a2o = conv3x3_bn_relu(h2e, h2o, b2_ref, bias2_ref)
    o_ref[0, 0:hi, :] = a2e.astype(o_ref.dtype)
    o_ref[0, hi:2 * hi, :] = a2o.astype(o_ref.dtype)


# ------------------------------ pallas_call wrapper -------------------------- #

def _nbytes(shape, dtype):
    return int(np.prod(shape)) * jnp.dtype(dtype).itemsize


def _decoder_pallas_call(prep, x, sk, *, n, h_in, wu):
    l1 = 2 * wu
    lx = x.shape[-1]

    def fullspec(a):
        nd = a.ndim
        return pl.BlockSpec(a.shape, lambda i: (0,) * nd)

    # vmem_limit from the actual footprint: every block is double-buffered by the
    # auto pipeliner (incl. the constant weights); add scratch and a 2x margin.
    blocks = (_nbytes((1, h_in, lx), jnp.bfloat16)
              + _nbytes((1, h_in, l1), jnp.bfloat16)
              + _nbytes((1, 2 * h_in, wu), jnp.float32)
              + sum(_nbytes(prep[k].shape, prep[k].dtype)
                    for k in ("B_up", "bias_up", "B1", "bias1", "B2", "bias2")))
    scratch = 2 * _nbytes((h_in + 2, l1), jnp.bfloat16) \
        + 2 * _nbytes((h_in + 2, wu), jnp.bfloat16)
    vmem_limit = int(max(2 * (2 * blocks + scratch), 8 * 1024 * 1024))

    kernel = functools.partial(_decoder_fused_kernel, h_in=h_in, wu=wu)
    return pl.pallas_call(
        kernel,
        out_shape=jax.ShapeDtypeStruct((n, 2 * h_in, wu), jnp.float32),
        grid=(n,),
        in_specs=[
            pl.BlockSpec((1, h_in, lx), lambda i: (i, 0, 0)),
            pl.BlockSpec((1, h_in, l1), lambda i: (i, 0, 0)),
            fullspec(prep["B_up"]),
            fullspec(prep["bias_up"]),
            fullspec(prep["B1"]),
            fullspec(prep["bias1"]),
            fullspec(prep["B2"]),
            fullspec(prep["bias2"]),
        ],
        out_specs=pl.BlockSpec((1, 2 * h_in, wu), lambda i: (i, 0, 0)),
        scratch_shapes=[
            pltpu.VMEM((h_in + 2, l1), jnp.bfloat16),
            pltpu.VMEM((h_in + 2, l1), jnp.bfloat16),
            pltpu.VMEM((h_in + 2, wu), jnp.bfloat16),
            pltpu.VMEM((h_in + 2, wu), jnp.bfloat16),
        ],
        compiler_params=pltpu.CompilerParams(
            dimension_semantics=("parallel",),   # v7x: one image per TensorCore
            vmem_limit_bytes=vmem_limit),
    )(x, sk, prep["B_up"], prep["bias_up"], prep["B1"], prep["bias1"],
      prep["B2"], prep["bias2"])


# ---------------------- prepare-time operand construction ------------------- #

def _build_deconv_mats(w_up, b_up, w_in, out_c):
    """ConvTranspose2d(k=2,s=2) as one matmul per input row producing the two
    output rows side by side: columns [even-row up | odd-row up], each half in
    pixel-major / channel-minor (NHWC) order."""
    in_c = int(np.shape(w_up)[0])
    w_out = 2 * w_in
    wu = w_out * out_c
    w = np.asarray(w_up, np.float32)          # (in_c, out_c, 2, 2)
    b = np.asarray(b_up, np.float32)

    p = np.arange(w_in * in_c)
    pj, ci = p // in_c, p % in_c               # input pixel, input channel
    q = np.arange(2 * wu)
    di = q // wu                               # output-row parity (kh of the deconv)
    rem = q % wu
    qx, qc = rem // out_c, rem % out_c         # output pixel x = 2*pj + dj, out channel
    vals = w[ci[:, None], qc[None, :], di[None, :], (qx % 2)[None, :]]
    bmat = np.where((qx // 2)[None, :] == pj[:, None], vals, 0.0)
    bias = b[qc]
    return (jnp.asarray(bmat, jnp.bfloat16),
            jnp.asarray(bias.reshape(1, -1), jnp.float32))


def _build_conv_bn_mats(w, b_conv, gamma, beta, mean, var, w_img,
                        blocked_concat=False, eps=1e-5):
    """Conv3x3(pad=1) + BN(eval) folded, as 3 banded (W*Ci, W*Co) matrices (one per
    kh tap, kw taps folded into the band) over the UNPADDED width — out-of-range
    kw taps are zeroed at prepare time.  When `blocked_concat` is True the input
    row layout is [all ch 0..Ci/2-1 ("up") pixels | all ch Ci/2..Ci-1 ("skip")
    pixels], i.e. the channel concat is absorbed into the band (free permutation)."""
    co, ci = int(np.shape(w)[0]), int(np.shape(w)[1])
    w = np.asarray(w, np.float32)              # (co, ci, 3, 3)
    scale = np.asarray(gamma, np.float32) / np.sqrt(np.asarray(var, np.float32) + eps)
    eff_w = w * scale[:, None, None, None]
    eff_b = (np.asarray(b_conv, np.float32) - np.asarray(mean, np.float32)) * scale \
        + np.asarray(beta, np.float32)

    r = np.arange(w_img * ci)
    if blocked_concat:
        half = ci // 2
        blk = r // (w_img * half)              # 0 = "up" block, 1 = "skip" block
        rr = r % (w_img * half)
        pw, cin = rr // half, rr % half + blk * half
    else:
        pw, cin = r // ci, r % ci
    q = np.arange(w_img * co)
    qw, qc = q // co, q % co                   # output pixel, output channel
    kw = pw[:, None] - qw[None, :] + 1         # unpadded width; boundary taps -> 0
    valid = (kw >= 0) & (kw <= 2)
    kwc = np.clip(kw, 0, 2)
    bands = np.zeros((3, r.size, q.size), np.float32)
    for kh in range(3):
        bands[kh] = np.where(valid, eff_w[qc[None, :], cin[:, None], kh, kwc], 0.0)
    bias = np.tile(eff_b, w_img)
    return (jnp.asarray(bands, jnp.bfloat16),
            jnp.asarray(bias.reshape(1, -1), jnp.float32))


def prepare_params(params, w_in, out_c, eps=1e-5):
    """Fold BN (eval mode) into the weights and lay everything out as matmul
    operands (banded block-Toeplitz matrices + f32 bias rows)."""
    w_out = 2 * w_in
    b_up, bias_up = _build_deconv_mats(params["w_up"], params["b_up"], w_in, out_c)
    b1, bias1 = _build_conv_bn_mats(params["w1"], params["b1"], params["g1"],
                                    params["be1"], params["m1"], params["v1"],
                                    w_out, blocked_concat=True, eps=eps)
    b2, bias2 = _build_conv_bn_mats(params["w2"], params["b2"], params["g2"],
                                    params["be2"], params["m2"], params["v2"],
                                    w_out, blocked_concat=False, eps=eps)
    return {"out_c": out_c, "B_up": b_up, "bias_up": bias_up,
            "B1": b1, "bias1": bias1, "B2": b2, "bias2": bias2}


# ------------------------------ forward pass -------------------------------- #

def decoder_block_forward(prep, x_nchw, skip_nchw):
    n, in_c, h_in, w_in = x_nchw.shape
    out_c = prep["out_c"]
    h_out, w_out = 2 * h_in, 2 * w_in
    wu = w_out * out_c

    # NCHW -> flattened NHWC rows (boundary transposes only); bf16 for the MXU.
    x = jnp.transpose(x_nchw, (0, 2, 3, 1)).reshape(n, h_in, w_in * in_c)
    x = x.astype(jnp.bfloat16)
    # Skip in row-paired layout [row 2p | row 2p+1] (free row-major reshape).
    sk = jnp.transpose(skip_nchw, (0, 2, 3, 1)).reshape(n, h_in, 2 * wu)
    sk = sk.astype(jnp.bfloat16)

    out = _decoder_pallas_call(prep, x, sk, n=n, h_in=h_in, wu=wu)

    # (n, [even rows | odd rows], W*C) -> NCHW.  The parity interleave is absorbed
    # into the NCHW transpose we must emit anyway for spec fidelity.
    # TODO(synk): if the consumer accepts NHWC, skip this transpose entirely.
    out = out.reshape(n, 2, h_in, w_out, out_c)
    return jnp.transpose(out, (0, 4, 2, 1, 3)).reshape(n, out_c, h_out, w_out)


# --------------------------- deterministic parameters ------------------------ #

def init_params(key, in_c, out_c):
    ks = jax.random.split(key, 12)
    cat_c = out_c + out_c
    rnd = lambda k, s: 0.1 * jax.random.normal(k, s, jnp.float32)
    return {
        "w_up": rnd(ks[0], (in_c, out_c, 2, 2)),
        "b_up": rnd(ks[1], (out_c,)),
        "w1": rnd(ks[2], (out_c, cat_c, 3, 3)),
        "b1": rnd(ks[3], (out_c,)),
        "g1": 1.0 + rnd(ks[4], (out_c,)),
        "be1": rnd(ks[5], (out_c,)),
        "m1": jnp.zeros((out_c,), jnp.float32),
        "v1": jnp.ones((out_c,), jnp.float32),
        "w2": rnd(ks[6], (out_c, out_c, 3, 3)),
        "b2": rnd(ks[7], (out_c,)),
        "g2": 1.0 + rnd(ks[8], (out_c,)),
        "be2": rnd(ks[9], (out_c,)),
        "m2": jnp.zeros((out_c,), jnp.float32),
        "v2": jnp.ones((out_c,), jnp.float32),
    }


# ------------------------------ pure-JAX reference --------------------------- #

def ref_forward(params, x, skip, eps=1e-5):
    wup = params["w_up"][:, :, ::-1, ::-1]
    wt = jnp.transpose(wup, (1, 0, 2, 3))  # [Cout, Cin, 2, 2]
    up = lax.conv_general_dilated(
        x, wt, window_strides=(1, 1), padding=((1, 1), (1, 1)),
        lhs_dilation=(2, 2), dimension_numbers=("NCHW", "OIHW", "NCHW"))
    up = up + params["b_up"][None, :, None, None]
    h = jnp.concatenate([up, skip], axis=1)

    def cbr(h, w, b, g, be, m, v):
        y = lax.conv_general_dilated(
            h, w, (1, 1), ((1, 1), (1, 1)),
            dimension_numbers=("NCHW", "OIHW", "NCHW"))
        y = y + b[None, :, None, None]
        y = (y - m[None, :, None, None]) / jnp.sqrt(v[None, :, None, None] + eps)
        y = y * g[None, :, None, None] + be[None, :, None, None]
        return jnp.maximum(y, 0.0)

    h = cbr(h, params["w1"], params["b1"], params["g1"], params["be1"],
            params["m1"], params["v1"])
    h = cbr(h, params["w2"], params["b2"], params["g2"], params["be2"],
            params["m2"], params["v2"])
    return h


# ---------------------------------- main ------------------------------------ #

if __name__ == "__main__":
    key = jax.random.PRNGKey(0)
    kx, ksk, kp = jax.random.split(key, 3)

    in_c, out_c = 8, 4
    n, h, w = 2, 16, 16
    x = jax.random.normal(kx, (n, in_c, h, w), jnp.float32)
    skip = jax.random.normal(ksk, (n, out_c, 2 * h, 2 * w), jnp.float32)
    params = init_params(kp, in_c, out_c)

    prep = prepare_params(params, w_in=w, out_c=out_c)
    fwd = jax.jit(functools.partial(decoder_block_forward, prep))
    out = jax.block_until_ready(fwd(x, skip))

    assert out.shape == (n, out_c, 2 * h, 2 * w), out.shape
    ref = ref_forward(params, x, skip)
    np.testing.assert_allclose(np.asarray(out), np.asarray(ref),
                               rtol=5e-2, atol=5e-2)
    print("KERNEL_OK")
</pallas_src>

<mosaic_0001>
module attributes {stable_mosaic.version = 11 : i64} {
  func.func @_decoder_fused_kernel(%arg0: i32, %arg1: memref<1x16x128xbf16, #tpu.memory_space<vmem>>, %arg2: memref<1x16x256xbf16, #tpu.memory_space<vmem>>, %arg3: memref<128x256xbf16, #tpu.memory_space<vmem>>, %arg4: memref<1x256xf32, #tpu.memory_space<vmem>>, %arg5: memref<3x256x128xbf16, #tpu.memory_space<vmem>>, %arg6: memref<1x128xf32, #tpu.memory_space<vmem>>, %arg7: memref<3x128x128xbf16, #tpu.memory_space<vmem>>, %arg8: memref<1x128xf32, #tpu.memory_space<vmem>>, %arg9: memref<1x32x128xf32, #tpu.memory_space<vmem>>, %arg10: memref<18x256xbf16, #tpu.memory_space<vmem>>, %arg11: memref<18x256xbf16, #tpu.memory_space<vmem>>, %arg12: memref<18x128xbf16, #tpu.memory_space<vmem>>, %arg13: memref<18x128xbf16, #tpu.memory_space<vmem>>) attributes {dimension_semantics = [#tpu.dimension_semantics<parallel>], iteration_bounds = array<i64: 2>, scalar_prefetch = 0 : i64, scratch_operands = 4 : i64, tpu.core_type = #tpu.core_type<tc>, window_params = [{transform_indices = @transform_0, window_bounds = array<i64: 1, 16, 128>}, {transform_indices = @transform_1, window_bounds = array<i64: 1, 16, 256>}, {pipeline_mode = #tpu.pipeline_mode<synchronous>, transform_indices = @transform_2, window_bounds = array<i64: 128, 256>}, {pipeline_mode = #tpu.pipeline_mode<synchronous>, transform_indices = @transform_3, window_bounds = array<i64: 1, 256>}, {pipeline_mode = #tpu.pipeline_mode<synchronous>, transform_indices = @transform_4, window_bounds = array<i64: 3, 256, 128>}, {pipeline_mode = #tpu.pipeline_mode<synchronous>, transform_indices = @transform_5, window_bounds = array<i64: 1, 128>}, {pipeline_mode = #tpu.pipeline_mode<synchronous>, transform_indices = @transform_6, window_bounds = array<i64: 3, 128, 128>}, {pipeline_mode = #tpu.pipeline_mode<synchronous>, transform_indices = @transform_7, window_bounds = array<i64: 1, 128>}, {transform_indices = @transform_8, window_bounds = array<i64: 1, 32, 128>}]} {
    %c0 = arith.constant 0 : index
    %c0_0 = arith.constant 0 : index
    %c0_1 = arith.constant 0 : index
    %0 = vector.load %arg1[%c0, %c0_0, %c0_1] : memref<1x16x128xbf16, #tpu.memory_space<vmem>>, vector<1x16x128xbf16>
    %1 = vector.shape_cast %0 : vector<1x16x128xbf16> to vector<16x128xbf16>
    %c0_2 = arith.constant 0 : index
    %c0_3 = arith.constant 0 : index
    %2 = vector.load %arg3[%c0_2, %c0_3] : memref<128x256xbf16, #tpu.memory_space<vmem>>, vector<128x256xbf16>
    %cst = arith.constant dense<0.000000e+00> : vector<16x256xf32>
    %3 = tpu.matmul %1, %2, %cst {dimension_numbers = #tpu.dot_dimension_numbers<[1], [0], [0], [1], [0, 0, 1, 1], [], []>} : vector<16x128xbf16>, vector<128x256xbf16>, vector<16x256xf32> -> vector<16x256xf32>
    %c0_4 = arith.constant 0 : index
    %c0_5 = arith.constant 0 : index
    %4 = vector.load %arg4[%c0_4, %c0_5] : memref<1x256xf32, #tpu.memory_space<vmem>>, vector<1x256xf32>
    %5 = vector.broadcast %4 : vector<1x256xf32> to vector<16x256xf32>
    %6 = arith.addf %3, %5 : vector<16x256xf32>
    %7 = arith.truncf %6 : vector<16x256xf32> to vector<16x256xbf16>
    %c0_6 = arith.constant 0 : index
    %c0_7 = arith.constant 0 : index
    %c0_8 = arith.constant 0 : index
    %8 = vector.load %arg2[%c0_6, %c0_7, %c0_8] : memref<1x16x256xbf16, #tpu.memory_space<vmem>>, vector<1x16x256xbf16>
    %9 = vector.shape_cast %8 : vector<1x16x256xbf16> to vector<16x256xbf16>
    %cst_9 = arith.constant 0.000000e+00 : bf16
    %10 = vector.broadcast %cst_9 : bf16 to vector<1x256xbf16>
    %c0_10 = arith.constant 0 : index
    %c0_11 = arith.constant 0 : index
    %11 = vector.load %arg10[%c0_10, %c0_11] : memref<18x256xbf16, #tpu.memory_space<vmem>>, vector<1x256xbf16>
    tpu.vector_store %arg10[%c0_10, %c0_11], %10 {strides = array<i32>} : memref<18x256xbf16, #tpu.memory_space<vmem>>, vector<1x256xbf16>,
    %c17 = arith.constant 17 : index
    %c0_12 = arith.constant 0 : index
    %12 = vector.load %arg10[%c17, %c0_12] : memref<18x256xbf16, #tpu.memory_space<vmem>>, vector<1x256xbf16>
    tpu.vector_store %arg10[%c17, %c0_12], %10 {strides = array<i32>} : memref<18x256xbf16, #tpu.memory_space<vmem>>, vector<1x256xbf16>,
    %c0_13 = arith.constant 0 : index
    %c0_14 = arith.constant 0 : index
    %13 = vector.load %arg11[%c0_13, %c0_14] : memref<18x256xbf16, #tpu.memory_space<vmem>>, vector<1x256xbf16>
    tpu.vector_store %arg11[%c0_13, %c0_14], %10 {strides = array<i32>} : memref<18x256xbf16, #tpu.memory_space<vmem>>, vector<1x256xbf16>,
    %c17_15 = arith.constant 17 : index
    %c0_16 = arith.constant 0 : index
    %14 = vector.load %arg11[%c17_15, %c0_16] : memref<18x256xbf16, #tpu.memory_space<vmem>>, vector<1x256xbf16>
    tpu.vector_store %arg11[%c17_15, %c0_16], %10 {strides = array<i32>} : memref<18x256xbf16, #tpu.memory_space<vmem>>, vector<1x256xbf16>,
    %15 = vector.extract_strided_slice %7 {offsets = [0, 0], sizes = [16, 128], strides = [1, 1]} : vector<16x256xbf16> to vector<16x128xbf16>
    %c1 = arith.constant 1 : index
    %c0_17 = arith.constant 0 : index
    %16 = vector.load %arg10[%c1, %c0_17] : memref<18x256xbf16, #tpu.memory_space<vmem>>, vector<16x128xbf16>
    tpu.vector_store %arg10[%c1, %c0_17], %15 {strides = array<i32>} : memref<18x256xbf16, #tpu.memory_space<vmem>>, vector<16x128xbf16>,
    %17 = vector.extract_strided_slice %7 {offsets = [0, 128], sizes = [16, 128], strides = [1, 1]} : vector<16x256xbf16> to vector<16x128xbf16>
    %c1_18 = arith.constant 1 : index
    %c0_19 = arith.constant 0 : index
    %18 = vector.load %arg11[%c1_18, %c0_19] : memref<18x256xbf16, #tpu.memory_space<vmem>>, vector<16x128xbf16>
    tpu.vector_store %arg11[%c1_18, %c0_19], %17 {strides = array<i32>} : memref<18x256xbf16, #tpu.memory_space<vmem>>, vector<16x128xbf16>,
    %19 = vector.extract_strided_slice %9 {offsets = [0, 0], sizes = [16, 128], strides = [1, 1]} : vector<16x256xbf16> to vector<16x128xbf16>
    %c1_20 = arith.constant 1 : index
    %c128 = arith.constant 128 : index
    %20 = vector.load %arg10[%c1_20, %c128] : memref<18x256xbf16, #tpu.memory_space<vmem>>, vector<16x128xbf16>
    tpu.vector_store %arg10[%c1_20, %c128], %19 {strides = array<i32>} : memref<18x256xbf16, #tpu.memory_space<vmem>>, vector<16x128xbf16>,
    %21 = vector.extract_strided_slice %9 {offsets = [0, 128], sizes = [16, 128], strides = [1, 1]} : vector<16x256xbf16> to vector<16x128xbf16>
    %c1_21 = arith.constant 1 : index
    %c128_22 = arith.constant 128 : index
    %22 = vector.load %arg11[%c1_21, %c128_22] : memref<18x256xbf16, #tpu.memory_space<vmem>>, vector<16x128xbf16>
    tpu.vector_store %arg11[%c1_21, %c128_22], %21 {strides = array<i32>} : memref<18x256xbf16, #tpu.memory_space<vmem>>, vector<16x128xbf16>,
    %c0_23 = arith.constant 0 : index
    %c0_24 = arith.constant 0 : index
    %c0_25 = arith.constant 0 : index
    %23 = vector.load %arg5[%c0_23, %c0_24, %c0_25] : memref<3x256x128xbf16, #tpu.memory_space<vmem>>, vector<1x256x128xbf16>
    %24 = vector.shape_cast %23 : vector<1x256x128xbf16> to vector<256x128xbf16>
    %c1_26 = arith.constant 1 : index
    %c0_27 = arith.constant 0 : index
    %c0_28 = arith.constant 0 : index
    %25 = vector.load %arg5[%c1_26, %c0_27, %c0_28] : memref<3x256x128xbf16, #tpu.memory_space<vmem>>, vector<1x256x128xbf16>
    %26 = vector.shape_cast %25 : vector<1x256x128xbf16> to vector<256x128xbf16>
    %c2 = arith.constant 2 : index
    %c0_29 = arith.constant 0 : index
    %c0_30 = arith.constant 0 : index
    %27 = vector.load %arg5[%c2, %c0_29, %c0_30] : memref<3x256x128xbf16, #tpu.memory_space<vmem>>, vector<1x256x128xbf16>
    %28 = vector.shape_cast %27 : vector<1x256x128xbf16> to vector<256x128xbf16>
    %c0_31 = arith.constant 0 : index
    %c0_32 = arith.constant 0 : index
    %29 = vector.load %arg6[%c0_31, %c0_32] : memref<1x128xf32, #tpu.memory_space<vmem>>, vector<1x128xf32>
    %c1_33 = arith.constant 1 : index
    %c0_34 = arith.constant 0 : index
    %30 = vector.load %arg10[%c1_33, %c0_34] : memref<18x256xbf16, #tpu.memory_space<vmem>>, vector<16x256xbf16>
    %c1_35 = arith.constant 1 : index
    %c0_36 = arith.constant 0 : index
    %31 = vector.load %arg11[%c1_35, %c0_36] : memref<18x256xbf16, #tpu.memory_space<vmem>>, vector<16x256xbf16>
    %c0_37 = arith.constant 0 : index
    %c0_38 = arith.constant 0 : index
    %32 = vector.load %arg11[%c0_37, %c0_38] : memref<18x256xbf16, #tpu.memory_space<vmem>>, vector<16x256xbf16>
    %cst_39 = arith.constant dense<0.000000e+00> : vector<16x128xf32>
    %33 = tpu.matmul %32, %24, %cst_39 {dimension_numbers = #tpu.dot_dimension_numbers<[1], [0], [0], [1], [0, 0, 1, 1], [], []>} : vector<16x256xbf16>, vector<256x128xbf16>, vector<16x128xf32> -> vector<16x128xf32>
    %cst_40 = arith.constant dense<0.000000e+00> : vector<16x128xf32>
    %34 = tpu.matmul %30, %26, %cst_40 {dimension_numbers = #tpu.dot_dimension_numbers<[1], [0], [0], [1], [0, 0, 1, 1], [], []>} : vector<16x256xbf16>, vector<256x128xbf16>, vector<16x128xf32> -> vector<16x128xf32>
    %35 = arith.addf %33, %34 : vector<16x128xf32>
    %cst_41 = arith.constant dense<0.000000e+00> : vector<16x128xf32>
    %36 = tpu.matmul %31, %28, %cst_41 {dimension_numbers = #tpu.dot_dimension_numbers<[1], [0], [0], [1], [0, 0, 1, 1], [], []>} : vector<16x256xbf16>, vector<256x128xbf16>, vector<16x128xf32> -> vector<16x128xf32>
    %37 = arith.addf %35, %36 : vector<16x128xf32>
    %cst_42 = arith.constant dense<0.000000e+00> : vector<16x128xf32>
    %38 = tpu.matmul %30, %24, %cst_42 {dimension_numbers = #tpu.dot_dimension_numbers<[1], [0], [0], [1], [0, 0, 1, 1], [], []>} : vector<16x256xbf16>, vector<256x128xbf16>, vector<16x128xf32> -> vector<16x128xf32>
    %cst_43 = arith.constant dense<0.000000e+00> : vector<16x128xf32>
    %39 = tpu.matmul %31, %26, %cst_43 {dimension_numbers = #tpu.dot_dimension_numbers<[1], [0], [0], [1], [0, 0, 1, 1], [], []>} : vector<16x256xbf16>, vector<256x128xbf16>, vector<16x128xf32> -> vector<16x128xf32>
    %40 = arith.addf %38, %39 : vector<16x128xf32>
    %c2_44 = arith.constant 2 : index
    %c0_45 = arith.constant 0 : index
    %41 = vector.load %arg10[%c2_44, %c0_45] : memref<18x256xbf16, #tpu.memory_space<vmem>>, vector<16x256xbf16>
    %cst_46 = arith.constant dense<0.000000e+00> : vector<16x128xf32>
    %42 = tpu.matmul %41, %28, %cst_46 {dimension_numbers = #tpu.dot_dimension_numbers<[1], [0], [0], [1], [0, 0, 1, 1], [], []>} : vector<16x256xbf16>, vector<256x128xbf16>, vector<16x128xf32> -> vector<16x128xf32>
    %43 = arith.addf %40, %42 : vector<16x128xf32>
    %44 = vector.broadcast %29 : vector<1x128xf32> to vector<16x128xf32>
    %45 = arith.addf %37, %44 : vector<16x128xf32>
    %cst_47 = arith.constant 0.000000e+00 : f32
    %46 = vector.broadcast %cst_47 : f32 to vector<16x128xf32>
    %47 = arith.maximumf %45, %46 : vector<16x128xf32>
    %48 = vector.broadcast %29 : vector<1x128xf32> to vector<16x128xf32>
    %49 = arith.addf %43, %48 : vector<16x128xf32>
    %cst_48 = arith.constant 0.000000e+00 : f32
    %50 = vector.broadcast %cst_48 : f32 to vector<16x128xf32>
    %51 = arith.maximumf %49, %50 : vector<16x128xf32>
    %cst_49 = arith.constant 0.000000e+00 : bf16
    %52 = vector.broadcast %cst_49 : bf16 to vector<1x128xbf16>
    %c0_50 = arith.constant 0 : index
    %c0_51 = arith.constant 0 : index
    %53 = vector.load %arg12[%c0_50, %c0_51] : memref<18x128xbf16, #tpu.memory_space<vmem>>, vector<1x128xbf16>
    tpu.vector_store %arg12[%c0_50, %c0_51], %52 {strides = array<i32>} : memref<18x128xbf16, #tpu.memory_space<vmem>>, vector<1x128xbf16>,
    %c17_52 = arith.constant 17 : index
    %c0_53 = arith.constant 0 : index
    %54 = vector.load %arg12[%c17_52, %c0_53] : memref<18x128xbf16, #tpu.memory_space<vmem>>, vector<1x128xbf16>
    tpu.vector_store %arg12[%c17_52, %c0_53], %52 {strides = array<i32>} : memref<18x128xbf16, #tpu.memory_space<vmem>>, vector<1x128xbf16>,
    %c0_54 = arith.constant 0 : index
    %c0_55 = arith.constant 0 : index
    %55 = vector.load %arg13[%c0_54, %c0_55] : memref<18x128xbf16, #tpu.memory_space<vmem>>, vector<1x128xbf16>
    tpu.vector_store %arg13[%c0_54, %c0_55], %52 {strides = array<i32>} : memref<18x128xbf16, #tpu.memory_space<vmem>>, vector<1x128xbf16>,
    %c17_56 = arith.constant 17 : index
    %c0_57 = arith.constant 0 : index
    %56 = vector.load %arg13[%c17_56, %c0_57] : memref<18x128xbf16, #tpu.memory_space<vmem>>, vector<1x128xbf16>
    tpu.vector_store %arg13[%c17_56, %c0_57], %52 {strides = array<i32>} : memref<18x128xbf16, #tpu.memory_space<vmem>>, vector<1x128xbf16>,
    %57 = arith.truncf %47 : vector<16x128xf32> to vector<16x128xbf16>
    %c1_58 = arith.constant 1 : index
    %c0_59 = arith.constant 0 : index
    %58 = vector.load %arg12[%c1_58, %c0_59] : memref<18x128xbf16, #tpu.memory_space<vmem>>, vector<16x128xbf16>
    tpu.vector_store %arg12[%c1_58, %c0_59], %57 {strides = array<i32>} : memref<18x128xbf16, #tpu.memory_space<vmem>>, vector<16x128xbf16>,
    %59 = arith.truncf %51 : vector<16x128xf32> to vector<16x128xbf16>
    %c1_60 = arith.constant 1 : index
    %c0_61 = arith.constant 0 : index
    %60 = vector.load %arg13[%c1_60, %c0_61] : memref<18x128xbf16, #tpu.memory_space<vmem>>, vector<16x128xbf16>
    tpu.vector_store %arg13[%c1_60, %c0_61], %59 {strides = array<i32>} : memref<18x128xbf16, #tpu.memory_space<vmem>>, vector<16x128xbf16>,
    %c0_62 = arith.constant 0 : index
    %c0_63 = arith.constant 0 : index
    %c0_64 = arith.constant 0 : index
    %61 = vector.load %arg7[%c0_62, %c0_63, %c0_64] : memref<3x128x128xbf16, #tpu.memory_space<vmem>>, vector<1x128x128xbf16>
    %62 = vector.shape_cast %61 : vector<1x128x128xbf16> to vector<128x128xbf16>
    %c1_65 = arith.constant 1 : index
    %c0_66 = arith.constant 0 : index
    %c0_67 = arith.constant 0 : index
    %63 = vector.load %arg7[%c1_65, %c0_66, %c0_67] : memref<3x128x128xbf16, #tpu.memory_space<vmem>>, vector<1x128x128xbf16>
    %64 = vector.shape_cast %63 : vector<1x128x128xbf16> to vector<128x128xbf16>
    %c2_68 = arith.constant 2 : index
    %c0_69 = arith.constant 0 : index
    %c0_70 = arith.constant 0 : index
    %65 = vector.load %arg7[%c2_68, %c0_69, %c0_70] : memref<3x128x128xbf16, #tpu.memory_space<vmem>>, vector<1x128x128xbf16>
    %66 = vector.shape_cast %65 : vector<1x128x128xbf16> to vector<128x128xbf16>
    %c0_71 = arith.constant 0 : index
    %c0_72 = arith.constant 0 : index
    %67 = vector.load %arg8[%c0_71, %c0_72] : memref<1x128xf32, #tpu.memory_space<vmem>>, vector<1x128xf32>
    %c1_73 = arith.constant 1 : index
    %c0_74 = arith.constant 0 : index
    %68 = vector.load %arg12[%c1_73, %c0_74] : memref<18x128xbf16, #tpu.memory_space<vmem>>, vector<16x128xbf16>
    %c1_75 = arith.constant 1 : index
    %c0_76 = arith.constant 0 : index
    %69 = vector.load %arg13[%c1_75, %c0_76] : memref<18x128xbf16, #tpu.memory_space<vmem>>, vector<16x128xbf16>
    %c0_77 = arith.constant 0 : index
    %c0_78 = arith.constant 0 : index
    %70 = vector.load %arg13[%c0_77, %c0_78] : memref<18x128xbf16, #tpu.memory_space<vmem>>, vector<16x128xbf16>
    %cst_79 = arith.constant dense<0.000000e+00> : vector<16x128xf32>
    %71 = tpu.matmul %70, %62, %cst_79 {dimension_numbers = #tpu.dot_dimension_numbers<[1], [0], [0], [1], [0, 0, 1, 1], [], []>} : vector<16x128xbf16>, vector<128x128xbf16>, vector<16x128xf32> -> vector<16x128xf32>
    %cst_80 = arith.constant dense<0.000000e+00> : vector<16x128xf32>
    %72 = tpu.matmul %68, %64, %cst_80 {dimension_numbers = #tpu.dot_dimension_numbers<[1], [0], [0], [1], [0, 0, 1, 1], [], []>} : vector<16x128xbf16>, vector<128x128xbf16>, vector<16x128xf32> -> vector<16x128xf32>
    %73 = arith.addf %71, %72 : vector<16x128xf32>
    %cst_81 = arith.constant dense<0.000000e+00> : vector<16x128xf32>
    %74 = tpu.matmul %69, %66, %cst_81 {dimension_numbers = #tpu.dot_dimension_numbers<[1], [0], [0], [1], [0, 0, 1, 1], [], []>} : vector<16x128xbf16>, vector<128x128xbf16>, vector<16x128xf32> -> vector<16x128xf32>
    %75 = arith.addf %73, %74 : vector<16x128xf32>
    %cst_82 = arith.constant dense<0.000000e+00> : vector<16x128xf32>
    %76 = tpu.matmul %68, %62, %cst_82 {dimension_numbers = #tpu.dot_dimension_numbers<[1], [0], [0], [1], [0, 0, 1, 1], [], []>} : vector<16x128xbf16>, vector<128x128xbf16>, vector<16x128xf32> -> vector<16x128xf32>
    %cst_83 = arith.constant dense<0.000000e+00> : vector<16x128xf32>
    %77 = tpu.matmul %69, %64, %cst_83 {dimension_numbers = #tpu.dot_dimension_numbers<[1], [0], [0], [1], [0, 0, 1, 1], [], []>} : vector<16x128xbf16>, vector<128x128xbf16>, vector<16x128xf32> -> vector<16x128xf32>
    %78 = arith.addf %76, %77 : vector<16x128xf32>
    %c2_84 = arith.constant 2 : index
    %c0_85 = arith.constant 0 : index
    %79 = vector.load %arg12[%c2_84, %c0_85] : memref<18x128xbf16, #tpu.memory_space<vmem>>, vector<16x128xbf16>
    %cst_86 = arith.constant dense<0.000000e+00> : vector<16x128xf32>
    %80 = tpu.matmul %79, %66, %cst_86 {dimension_numbers = #tpu.dot_dimension_numbers<[1], [0], [0], [1], [0, 0, 1, 1], [], []>} : vector<16x128xbf16>, vector<128x128xbf16>, vector<16x128xf32> -> vector<16x128xf32>
    %81 = arith.addf %78, %80 : vector<16x128xf32>
    %82 = vector.broadcast %67 : vector<1x128xf32> to vector<16x128xf32>
    %83 = arith.addf %75, %82 : vector<16x128xf32>
    %cst_87 = arith.constant 0.000000e+00 : f32
    %84 = vector.broadcast %cst_87 : f32 to vector<16x128xf32>
    %85 = arith.maximumf %83, %84 : vector<16x128xf32>
    %86 = vector.broadcast %67 : vector<1x128xf32> to vector<16x128xf32>
    %87 = arith.addf %81, %86 : vector<16x128xf32>
    %cst_88 = arith.constant 0.000000e+00 : f32
    %88 = vector.broadcast %cst_88 : f32 to vector<16x128xf32>
    %89 = arith.maximumf %87, %88 : vector<16x128xf32>
    %c0_89 = arith.constant 0 : index
    %c0_90 = arith.constant 0 : index
    %c0_91 = arith.constant 0 : index
    %90 = vector.load %arg9[%c0_89, %c0_90, %c0_91] : memref<1x32x128xf32, #tpu.memory_space<vmem>>, vector<1x16x128xf32>
    %91 = vector.shape_cast %90 : vector<1x16x128xf32> to vector<16x128xf32>
    %92 = vector.shape_cast %85 : vector<16x128xf32> to vector<1x16x128xf32>
    tpu.vector_store %arg9[%c0_89, %c0_90, %c0_91], %92 {strides = array<i32>} : memref<1x32x128xf32, #tpu.memory_space<vmem>>, vector<1x16x128xf32>,
    %c0_92 = arith.constant 0 : index
    %c16 = arith.constant 16 : index
    %c0_93 = arith.constant 0 : index
    %93 = vector.load %arg9[%c0_92, %c16, %c0_93] : memref<1x32x128xf32, #tpu.memory_space<vmem>>, vector<1x16x128xf32>
    %94 = vector.shape_cast %93 : vector<1x16x128xf32> to vector<16x128xf32>
    %95 = vector.shape_cast %89 : vector<16x128xf32> to vector<1x16x128xf32>
    tpu.vector_store %arg9[%c0_92, %c16, %c0_93], %95 {strides = array<i32>} : memref<1x32x128xf32, #tpu.memory_space<vmem>>, vector<1x16x128xf32>,
    return
  }
  func.func @transform_0(%arg0: i32) -> (i32, i32, i32) {
    %c0_i32 = arith.constant 0 : i32
    %c0_i32_0 = arith.constant 0 : i32
    %c0_i32_1 = arith.constant 0 : i32
    return %arg0, %c0_i32, %c0_i32_0 : i32, i32, i32
  }
  func.func @transform_1(%arg0: i32) -> (i32, i32, i32) {
    %c0_i32 = arith.constant 0 : i32
    %c0_i32_0 = arith.constant 0 : i32
    %c0_i32_1 = arith.constant 0 : i32
    return %arg0, %c0_i32, %c0_i32_0 : i32, i32, i32
  }
  func.func @transform_2(%arg0: i32) -> (i32, i32) {
    %c0_i32 = arith.constant 0 : i32
    %c0_i32_0 = arith.constant 0 : i32
    %c0_i32_1 = arith.constant 0 : i32
    return %c0_i32, %c0_i32_0 : i32, i32
  }
  func.func @transform_3(%arg0: i32) -> (i32, i32) {
    %c0_i32 = arith.constant 0 : i32
    %c0_i32_0 = arith.constant 0 : i32
    %c0_i32_1 = arith.constant 0 : i32
    return %c0_i32, %c0_i32_0 : i32, i32
  }
  func.func @transform_4(%arg0: i32) -> (i32, i32, i32) {
    %c0_i32 = arith.constant 0 : i32
    %c0_i32_0 = arith.constant 0 : i32
    %c0_i32_1 = arith.constant 0 : i32
    %c0_i32_2 = arith.constant 0 : i32
    return %c0_i32, %c0_i32_0, %c0_i32_1 : i32, i32, i32
  }
  func.func @transform_5(%arg0: i32) -> (i32, i32) {
    %c0_i32 = arith.constant 0 : i32
    %c0_i32_0 = arith.constant 0 : i32
    %c0_i32_1 = arith.constant 0 : i32
    return %c0_i32, %c0_i32_0 : i32, i32
  }
  func.func @transform_6(%arg0: i32) -> (i32, i32, i32) {
    %c0_i32 = arith.constant 0 : i32
    %c0_i32_0 = arith.constant 0 : i32
    %c0_i32_1 = arith.constant 0 : i32
    %c0_i32_2 = arith.constant 0 : i32
    return %c0_i32, %c0_i32_0, %c0_i32_1 : i32, i32, i32
  }
  func.func @transform_7(%arg0: i32) -> (i32, i32) {
    %c0_i32 = arith.constant 0 : i32
    %c0_i32_0 = arith.constant 0 : i32
    %c0_i32_1 = arith.constant 0 : i32
    return %c0_i32, %c0_i32_0 : i32, i32
  }
  func.func @transform_8(%arg0: i32) -> (i32, i32, i32) {
    %c0_i32 = arith.constant 0 : i32
    %c0_i32_0 = arith.constant 0 : i32
    %c0_i32_1 = arith.constant 0 : i32
    return %arg0, %c0_i32, %c0_i32_0 : i32, i32, i32
  }
}

</mosaic_0001>

<bundles_post_ra>
// kernel: decoder_block_forward.1
= control target key start
LH: loop header
LB: loop body
LE: loop exit
PB: predicated region body
PF: predicated region fallthrough
CT: control target
= control target key end

     0   :  { %s2760_s27 = smov 0   ;;  %s3489_s0 = inlined_call_operand.vmem [shape: bf16[2,16,128], index: 0, kind: input, shape index: {}]   ;;  %s3490_s1 = inlined_call_operand.vmem [shape: bf16[2,16,256], index: 1, kind: input, shape index: {}]   ;;  %s3491_s2 = inlined_call_operand.vmem [shape: bf16[128,256], index: 2, kind: input, shape index: {}]   ;;  %s3492_s3 = inlined_call_operand.vmem [shape: f32[1,256], index: 3, kind: input, shape index: {}]   ;;  %s3493_s4 = inlined_call_operand.vmem [shape: bf16[3,256,128], index: 4, kind: input, shape index: {}]   ;;  %s3494_s5 = inlined_call_operand.vmem [shape: f32[1,128], index: 5, kind: input, shape index: {}]   ;;  %s3495_s6 = inlined_call_operand.vmem [shape: bf16[3,128,128], index: 6, kind: input, shape index: {}]   ;;  %s3496_s7 = inlined_call_operand.vmem [shape: f32[1,128], index: 7, kind: input, shape index: {}]   ;;  %s3497_s8 = inlined_call_operand.vmem [shape: f32[2,32,128], index: 8, kind: output, shape index: {}]  }
   0x1 LB: > { %s2040_s28 = sadd.s32 4294967295, %s2710_s27   ;;  %p2044_p0 = scmp.ge.s32.totalorder %s2710_s27, 1  ;;  %s2710_s27 = sphi %s2760_s27, %s18_s27  }
   0x2   : > { %p272_p1 = scmp.lt.s32.totalorder %s2710_s27, 3 }
   0x4   : > { %p273_p2 = pnand %p2044_p0, %p272_p1 }
   0x5   : > { %v2591_v0 = vld [vmem:[%s3491_s2 + $0x4] ss:$8 sps:$4 sm:$0xff] (!%p273_p2)   ;;  %p311_p3 = scmp.lt.s32.totalorder (!%p273_p2), %s2040_s28, 1  ;;  %v2593_v1 = vld [vmem:[%s3491_s2] ss:$8 sps:$4 sm:$0xff] (!%p273_p2)   ;;  %v2712_v2 = vmov (!%p273_p2), 0  }
   0x6   : > { %276 = sbr.rel (%p273_p2) target bundleno = 872 (0x368), region = 52  ;;  %475 = vmatprep.mubr.bf16.mxu0 (!%p273_p2), %v2712_v2  ;;  %443 = vmatprep.subr.bf16.mxu0 (!%p273_p2), %v2591_v0  ;;  %v2594_v3 = vld [vmem:[%s3491_s2 + $0x14] ss:$8 sps:$4 sm:$0xff] (!%p273_p2)   ;;  %v2596_v4 = vld [vmem:[%s3491_s2 + $0x10] ss:$8 sps:$4 sm:$0xff] (!%p273_p2)   ;;  %v2810_v12 = vld [vmem:[%s3493_s4 + $0xc0] sm:$0xff] (!%p273_p2)  }
   0x7   : > { %444 = vmatpush1.bf16.msra.mxu0 (!%p273_p2), %v2593_v1  ;;  %v2597_v5 = vld [vmem:[%s3491_s2 + $0x24] ss:$8 sps:$4 sm:$0xff] (!%p273_p2)   ;;  %v2599_v6 = vld [vmem:[%s3491_s2 + $0x20] ss:$8 sps:$4 sm:$0xff] (!%p273_p2)   ;;  %v2600_v7 = vld [vmem:[%s3491_s2 + $0x34] ss:$8 sps:$4 sm:$0xff] (!%p273_p2)   ;;  %2274 = vmatprep.subr.bf16.mxu1 (!%p273_p2), %v2810_v12 }
   0x8   : > { %445 = vmatprep.subr.bf16.mxu0 (!%p273_p2), %v2594_v3  ;;  %v2602_v8 = vld [vmem:[%s3491_s2 + $0x30] ss:$8 sps:$4 sm:$0xff] (!%p273_p2)   ;;  %v2603_v9 = vld [vmem:[%s3491_s2 + $0x44] ss:$8 sps:$4 sm:$0xff] (!%p273_p2)   ;;  %v2605_v10 = vld [vmem:[%s3491_s2 + $0x40] ss:$8 sps:$4 sm:$0xff] (!%p273_p2)  }
   0x9   : > { %v2606_v11 = vld [vmem:[%s3491_s2 + $0x54] ss:$8 sps:$4 sm:$0xff] (!%p273_p2)   ;;  %v2608_v13 = vld [vmem:[%s3491_s2 + $0x50] ss:$8 sps:$4 sm:$0xff] (!%p273_p2)   ;;  %v2609_v14 = vld [vmem:[%s3491_s2 + $0x64] ss:$8 sps:$4 sm:$0xff] (!%p273_p2)  }
   0xa   : > { %v2611_v15 = vld [vmem:[%s3491_s2 + $0x60] ss:$8 sps:$4 sm:$0xff] (!%p273_p2)   ;;  %v2612_v16 = vld [vmem:[%s3491_s2 + $0x74] ss:$8 sps:$4 sm:$0xff] (!%p273_p2)   ;;  %v2614_v17 = vld [vmem:[%s3491_s2 + $0x70] ss:$8 sps:$4 sm:$0xff] (!%p273_p2)  }
   0xb   : > { %446 = vmatpush1.bf16.msra.mxu0 (!%p273_p2), %v2596_v4  ;;  %v2831_v18 = vld [vmem:[%s3493_s4 + $0x40] sm:$0xff] (!%p273_p2)   ;;  %v2841_v21 = vld [vmem:[%s3493_s4 + $0x48] sm:$0xff] (!%p273_p2)   ;;  %v2864_v27 = vld [vmem:[%s3493_s4 + $0x50] sm:$0xff] (!%p273_p2)   ;;  %vm490_vm0 = vcmask (!%p273_p2), 1040384   ;;  %vm491_vm1 = vsmask.f32 (!%p273_p2), 256 }
   0xc   : > { %447 = vmatprep.subr.bf16.mxu0 (!%p273_p2), %v2597_v5  ;;  %v2836_v20 = vld [vmem:[%s3493_s4] sm:$0xff] (!%p273_p2)   ;;  %v2847_v22 = vld [vmem:[%s3493_s4 + $0x8] sm:$0xff] (!%p273_p2)   ;;  %vm493_vm2 = vcmask (!%p273_p2), 1044484   ;;  %vm494_vm3 = vsmask.f32 (!%p273_p2), 4352  ;;  %vm2870_vm4 = vmand (!%p273_p2), %vm490_vm0, %vm491_vm1  ;;  %vm541_vm12 = vcmask (!%p273_p2), 1043456  }
   0xd   : > { %s3507_s28 = smov (!%p311_p3, %s2040_s28), 1  ;;  %v2859_v26 = vld [vmem:[%s3493_s4 + $0x80] sm:$0xff]   ;;  %v2879_v32 = vld [vmem:[%s3493_s4 + $0x10] sm:$0xff]   ;;  %vm495_vm5 = vmand %vm493_vm2, %vm494_vm3  ;;  %vm500_vm6 = vsmask.f32 7938 }
   0xe   : > { %s2263_s17 = sshll.u32 %s3507_s28, 3  ;;  %2275 = vmatpush3.bf16.msra.mxu1 %v2859_v26  ;;  %v497_v33 = vld [vmem:[#allocation2] sm:$0x11]  ;;  %vm502_vm7 = vsmask.f32 7954  ;;  %vm496_vm8 = vmor %vm495_vm5, %vm2870_vm4  ;;  %v2888_v35 = vld [vmem:[%s3493_s4 + $0xc8] sm:$0xff]  }
   0xf   : > { %s315_s24 = scalar_lea.vmem %s3489_s0, %s2263_s17  ;;  %448 = vmatpush1.bf16.msra.mxu0 %v2599_v6  ;;  %v508_v34 = vld [vmem:[#allocation3] sm:$0x11]  ;;  %v498_v36 = vsel %vm496_vm8, 0, %v497_v33  ;;  %vm2892_vm9 = vmand %vm490_vm0, %vm500_vm6  ;;  %v505_v39 = vld [vmem:[#allocation2 + $0x10] sm:$0x11]  ;;  %2276 = vmatprep.subr.bf16.mxu1 %v2888_v35  ;;  %v347_v33 = vlaneseq  ;;  %s2265_s17 = sshll.u32 %s3507_s28, 5 }
  0x10   : > { %449 = vmatprep.subr.bf16.mxu0 %v2600_v7  ;;  %v2615_v19 = vld [vmem:[%s315_s24] sm:$0xff]   ;;  %s2264_s24 = sshll.u32 %s3507_s28, 4  ;;  %v509_v38 = vsel %vm496_vm8, 0, %v508_v34  ;;  %v2899_v40 = vld [vmem:[%s3493_s4 + $0x88] sm:$0xff]   ;;  %499 = vst [vmem:[#allocation2] sm:$0x11] %v498_v36  ;;  %vm503_vm10 = vmand %vm493_vm2, %vm502_vm7  ;;  %s325_s20 = scalar_lea.vmem %s3497_s8, %s2265_s17 }
  0x11   : > { %s320_s16 = scalar_lea.vmem %s3490_s1, %s2264_s24  ;;  %510 = vst [vmem:[#allocation3] sm:$0x11] %v509_v38  ;;  %v511_v42 = vld [vmem:[#allocation3 + $0x10] sm:$0x11]  ;;  %v2906_v43 = vld [vmem:[%s3493_s4 + $0x58] sm:$0xff]   ;;  %vm504_vm11 = vmor %vm503_vm10, %vm2892_vm9  ;;  %v348_v34 = vshrl.u32 %v347_v33, 7 }
  0x12   : > { %v488_v23 = vld [vmem:[%s320_s16] sm:$0xff]  ;;  %v489_v25 = vld [vmem:[%s320_s16 + $0x8] sm:$0xff]  ;;  %2277 = vmatpush3.bf16.msra.mxu1 %v2899_v40  ;;  %v2915_v46 = vld [vmem:[%s3493_s4 + $0x18] sm:$0xff]   ;;  %v506_v48 = vsel %vm504_vm11, 0, %v505_v39  ;;  %v512_v49 = vsel %vm504_vm11, 0, %v511_v42  ;;  %vm2714_vm2 = vmmov 0  }
  0x13   : > { %450 = vmatpush1.bf16.msra.mxu0 %v2602_v8  ;;  %v583_v24 = vshrl.u32 %v488_v23, 16  ;;  %v586_v29 = vshll.u32 %v488_v23, 16  ;;  %v591_v30 = vshrl.u32 %v489_v25, 16  ;;  %v594_v45 = vshll.u32 %v489_v25, 16  ;;  %v2920_v47 = vld [vmem:[%s3493_s4 + $0xd0] sm:$0xff]   ;;  %v2931_v51 = vld [vmem:[%s3493_s4 + $0x60] sm:$0xff]   ;;  %vm2949_vm13 = vmand %vm541_vm12, %vm500_vm6 }
  0x14   : > { %451 = vmatprep.subr.bf16.mxu0 %v2603_v9  ;;  %v2926_v50 = vld [vmem:[%s3493_s4 + $0x90] sm:$0xff]   ;;  %507 = vst [vmem:[#allocation2 + $0x10] sm:$0x11] %v506_v48  ;;  %513 = vst [vmem:[#allocation3 + $0x10] sm:$0x11] %v512_v49  ;;  %2278 = vmatprep.subr.bf16.mxu1 %v2920_v47  ;;  %v2938_v52 = vld [vmem:[%s3493_s4 + $0x20] sm:$0xff]  }
  0x15   : > { %v2866_v28 = vrot.slane %v583_v24, 7  ;;  %v593_v41 = vrot.slane %v591_v30, 7  ;;  %v2946_v57 = vld [vmem:[%s3493_s4 + $0xd8] sm:$0xff]   ;;  %vm519_vm14 = vsmask.f32 4368  ;;  %v2961_v60 = vld [vmem:[%s3493_s4 + $0x68] sm:$0xff]  }
  0x16   : > { %2279 = vmatpush3.bf16.msra.mxu1 %v2926_v50  ;;  %v2956_v59 = vld [vmem:[%s3493_s4 + $0x98] sm:$0xff]   ;;  %v1384_v0 = vld [vmem:[#allocation5 + $0x8] sm:$0x1]  ;;  %vm2968_vm15 = vmor %vm491_vm1, %vm519_vm14  ;;  %v349_v36 = vsub.s32 0, %v348_v34  ;;  %v353_v39 = vsub.s32 1, %v348_v34  ;;  %vm1309_vm1 = vcmask 1046528  }
  0x17   : > { %452 = vmatpush1.bf16.msra.mxu0 %v2605_v10  ;;  %v588_v44 = vor.u32 %v586_v29, %v2866_v28  ;;  %v598_v53 = vrot.slane %v593_v41, 4  ;;  %v589_v54 = vrot.slane %v2866_v28, 4  ;;  %v596_v55 = vor.u32 %v594_v45, %v593_v41  ;;  %v602_v61 = vld [vmem:[#allocation2 + $0x4] sm:$0xf]  ;;  %2280 = vmatprep.subr.bf16.mxu1 %v2946_v57  ;;  %v2983_v6 = vld [vmem:[%s3493_s4 + $0x28] sm:$0xff]   ;;  %v3026_v23 = vld [vmem:[%s3493_s4 + $0x78] sm:$0xff]  }
  0x18   : > { %453 = vmatprep.subr.bf16.mxu0 %v2606_v11  ;;  %v615_v1 = vld [vmem:[#allocation3 + $0x4] sm:$0xf]  ;;  %v1385_v3 = vsel %vm2892_vm9, 0, %v1384_v0  ;;  %v2988_v7 = vld [vmem:[%s3493_s4 + $0xe0] sm:$0xff]   ;;  %v3032_v24 = vld [vmem:[%s3493_s4 + $0xf0] sm:$0xff]  }
  0x19   : > { %v609_v56 = vrot.slane %v588_v44, 4  ;;  %v611_v62 = vrot.slane %v598_v53, 4  ;;  %v603_v63 = vsel %vm2949_vm13, %v588_v44, %v602_v61  ;;  %v597_v5 = vsel %vm2968_vm15, %v589_v54, %v596_v55  ;;  %1386 = vst [vmem:[#allocation5 + $0x8] sm:$0x1] %v1385_v3  ;;  %v2993_v10 = vld [vmem:[%s3493_s4 + $0xa0] sm:$0xff]   ;;  %v3038_v25 = vld [vmem:[%s3493_s4 + $0x38] sm:$0xff]  }
  0x1a   : > { %604 = vst [vmem:[#allocation2 + $0x4] sm:$0xf] %v603_v63  ;;  %2281 = vmatpush3.bf16.msra.mxu1 %v2956_v59  ;;  %605 = vst [vmem:[#allocation2 + $0xc] sm:$0xf] %v597_v5  ;;  %v610_v9 = vrot.slane %v597_v5, 4  ;;  %v3045_v28 = vld [vmem:[%s3493_s4 + $0xb0] sm:$0xff]  }
  0x1b   : > { %454 = vmatpush1.bf16.msra.mxu0 %v2608_v13  ;;  %v616_v4 = vsel %vm2949_vm13, %v609_v56, %v615_v1  ;;  %v606_v8 = vld [vmem:[#allocation2 + $0x14] sm:$0x1]  ;;  %v619_v13 = vld [vmem:[#allocation3 + $0x14] sm:$0x1]  ;;  %2282 = vmatprep.subr.bf16.mxu1 %v2988_v7  ;;  %v3054_v29 = vld [vmem:[%s3493_s4 + $0xf8] sm:$0xff]  }
  0x1c   : > { %455 = vmatprep.subr.bf16.mxu0 %v2609_v14  ;;  %617 = vst [vmem:[#allocation3 + $0x4] sm:$0xf] %v616_v4  ;;  %v607_v11 = vsel %vm2870_vm4, %v598_v53, %v606_v8  ;;  %v3002_v14 = vld [vmem:[%s3493_s4 + $0x70] sm:$0xff]   ;;  %618 = vst [vmem:[#allocation3 + $0xc] sm:$0xf] %v610_v9  ;;  %v3059_v30 = vld [vmem:[%s3493_s4 + $0xb8] sm:$0xff]  }
  0x1d   : > { %608 = vst [vmem:[#allocation2 + $0x14] sm:$0x1] %v607_v11  ;;  %v345_v38 = vld [vmem:[%s3492_s3] sm:$0x3]  ;;  %v575_v34 = vld [vmem:[#allocation3] sm:$0xf] }
  0x1e   : > { %2283 = vmatpush3.bf16.msra.mxu1 %v2993_v10  ;;  %v350_v41 = vrot.slane %v345_v38, %v349_v36  ;;  %v354_v42 = vrot.slane %v345_v38, %v353_v39  ;;  %v543_v9 = vld [vmem:[#allocation2] sm:$0xf]  ;;  %vm740_vm0 = vsmask.f32 7424  ;;  %v3405_v58 = vld [vmem:[%s3495_s6 + $0xa8] sm:$0xff]   ;;  %v3412_v2 = vld [vmem:[%s3495_s6 + $0xb0] sm:$0xff]  }
  0x1f   : > { %456 = vmatpush1.bf16.msra.mxu0 %v2611_v15  ;;  %v620_v15 = vsel %vm2870_vm4, %v611_v62, %v619_v13  ;;  %v3244_v37 = vld [vmem:[%s3495_s6 + $0x60] sm:$0xff]  }
  0x20   : > { %457 = vmatprep.subr.bf16.mxu0 %v2612_v16  ;;  %v3009_v16 = vld [vmem:[%s3493_s4 + $0x30] sm:$0xff]   ;;  %621 = vst [vmem:[#allocation3 + $0x14] sm:$0x1] %v620_v15 }
  0x23   : > { %458 = vmatpush1.bf16.msra.mxu0 %v2614_v17  ;;  %v3014_v17 = vld [vmem:[%s3493_s4 + $0xe8] sm:$0xff]  }
  0x24   : > { %2296 = vmatprep.subr.bf16.mxu0 %v2831_v18  ;;  %2284 = vmatprep.subr.bf16.mxu1 %v3014_v17 }
  0x26   : > { %476 = vmatmul.mubr.bf16.vlgmr.msra.gmra.mrb[0].mxu0 %v2615_v19  ;;  %v3021_v19 = vld [vmem:[%s3493_s4 + $0xa8] sm:$0xff]  }
  0x27   : > { %2297 = vmatpush3.bf16.msra.mxu0 %v2836_v20  ;;  %2285 = vmatpush3.bf16.msra.mxu1 %v3021_v19 }
  0x28   : > { %2298 = vmatprep.subr.bf16.mxu0 %v2841_v21  ;;  %2286 = vmatprep.subr.bf16.mxu1 %v3032_v24 }
  0x2b   : > { %2299 = vmatpush3.bf16.msra.mxu0 %v2847_v22  ;;  %2287 = vmatpush3.bf16.msra.mxu1 %v3045_v28 }
  0x2c   : > { %2300 = vmatprep.subr.bf16.mxu0 %v2864_v27  ;;  %2288 = vmatprep.subr.bf16.mxu1 %v3054_v29 }
  0x2f   : > { %2301 = vmatpush3.bf16.msra.mxu0 %v2879_v32  ;;  %2289 = vmatpush3.bf16.msra.mxu1 %v3059_v30 }
  0x30   : > { %2302 = vmatprep.subr.bf16.mxu0 %v2906_v43 }
  0x33   : > { %2303 = vmatpush3.bf16.msra.mxu0 %v2915_v46 }
  0x34   : > { %2304 = vmatprep.subr.bf16.mxu0 %v2931_v51 }
  0x37   : > { %2305 = vmatpush3.bf16.msra.mxu0 %v2938_v52 }
  0x38   : > { %2306 = vmatprep.subr.bf16.mxu0 %v2961_v60 }
  0x3b   : > { %2307 = vmatpush3.bf16.msra.mxu0 %v2983_v6 }
  0x3c   : > { %2308 = vmatprep.subr.bf16.mxu0 %v3002_v14 }
  0x3f   : > { %2309 = vmatpush3.bf16.msra.mxu0 %v3009_v16 }
  0x40   : > { %2310 = vmatprep.subr.bf16.mxu0 %v3026_v23 }
  0x43   : > { %2311 = vmatpush3.bf16.msra.mxu0 %v3038_v25 }
  0x44   : > { %2340 = vmatprep.subr.bf16.mxu0 %v2810_v12  ;;  %v3066_v12 = vld [vmem:[%s3493_s4 + $0x140] sm:$0xff]  }
  0x45   : > { %2318 = vmatprep.subr.bf16.mxu1 %v3066_v12 }
  0xf9   : > { %v477_v44 = vpop.f32.mrb[0].mxu0 }
  0xfa   : > { %v478_v45 = vadd.f32 %v477_v44, %v350_v41  ;;  %v479_v48 = vpop.f32.mrb[1].mxu0 }
  0xfb   : > { %v480_v49 = vadd.f32 %v479_v48, %v354_v42  ;;  %v481_v53 = vpop.f32.mrb[2].mxu0 }
  0xfc   : > { %v2266_v54 = vpack.c.bf16 %v478_v45, %v478_v45  ;;  %v482_v55 = vadd.f32 %v481_v53, %v350_v41  ;;  %v483_v56 = vpop.f32.mrb[3].mxu0  ;;  %v547_v41 = vld [vmem:[#allocation2 + $0x10] sm:$0x1] }
  0xfd   : > { %v2268_v61 = vpack.c.bf16 %v480_v49, %v480_v49  ;;  %v484_v62 = vadd.f32 %v483_v56, %v354_v42 }
  0xfe   : > { %v522_v63 = vshrl.u32 %v2266_v54, 16  ;;  %v2267_v0 = vpack.c.bf16 %v482_v55, %v482_v55  ;;  %v525_v5 = vshll.u32 %v2266_v54, 16  ;;  %v579_v54 = vld [vmem:[#allocation3 + $0x10] sm:$0x1] }
  0xff   : > { %v556_v1 = vshrl.u32 %v2268_v61, 16  ;;  %v2269_v3 = vpack.c.bf16 %v484_v62, %v484_v62  ;;  %v559_v13 = vshll.u32 %v2268_v61, 16 }
 0x100   : > { %v524_v4 = vrot.slane %v522_v63, 7  ;;  %v530_v8 = vshrl.u32 %v2267_v0, 16  ;;  %v533_v38 = vshll.u32 %v2267_v0, 16 }
 0x101   : > { %v558_v11 = vrot.slane %v556_v1, 7  ;;  %v564_v15 = vshrl.u32 %v2269_v3, 16  ;;  %v567_v45 = vshll.u32 %v2269_v3, 16 }
 0x102   : > { %v527_v33 = vor.u32 %v525_v5, %v524_v4  ;;  %v532_v36 = vrot.slane %v530_v8, 7  ;;  %v528_v42 = vrot.slane %v524_v4, 4 }
 0x103   : > { %v561_v39 = vor.u32 %v559_v13, %v558_v11  ;;  %v566_v44 = vrot.slane %v564_v15, 7  ;;  %v562_v55 = vrot.slane %v558_v11, 4  ;;  %v2648_v11 = vld [vmem:[#allocation3 + $0x4] ss:$8 sps:$4 sm:$0xff]  }
 0x104   : > { %v544_v48 = vsel %vm2949_vm13, %v527_v33, %v543_v9  ;;  %v535_v49 = vor.u32 %v533_v38, %v532_v36  ;;  %v537_v53 = vrot.slane %v532_v36, 4  ;;  %1042 = vmatprep.mubr.bf16.mxu0 %v2648_v11  ;;  %v1071_v38 = vshll.u32 %v2648_v11, 16 }
 0x105   : > { %545 = vst [vmem:[#allocation2] sm:$0xf] %v544_v48  ;;  %v576_v56 = vsel %vm2949_vm13, %v561_v39, %v575_v34  ;;  %v569_v61 = vor.u32 %v567_v45, %v566_v44  ;;  %v571_v62 = vrot.slane %v566_v44, 4 }
 0x106   : > { %577 = vst [vmem:[#allocation3] sm:$0xf] %v576_v56  ;;  %v536_v63 = vsel %vm2968_vm15, %v528_v42, %v535_v49  ;;  %v548_v0 = vsel %vm2870_vm4, %v537_v53, %v547_v41  ;;  %v1069_v53 = vshrl.u32 %v2648_v11, 16 }
 0x107   : > { %546 = vst [vmem:[#allocation2 + $0x8] sm:$0xf] %v536_v63  ;;  %549 = vst [vmem:[#allocation2 + $0x10] sm:$0x1] %v548_v0  ;;  %v570_v1 = vsel %vm2968_vm15, %v562_v55, %v569_v61  ;;  %v580_v3 = vsel %vm2870_vm4, %v571_v62, %v579_v54  ;;  %v1073_v54 = vrot.slane %v1071_v38, 1  ;;  %v2663_v38 = vld [vmem:[%s3493_s4 + $0x118] sm:$0xff]  }
 0x108   : > { %578 = vst [vmem:[#allocation3 + $0x8] sm:$0xf] %v570_v1  ;;  %581 = vst [vmem:[#allocation3 + $0x10] sm:$0x1] %v580_v3 }
 0x109   : > { %v1074_v0 = vor.u32 %v1073_v54, %v1069_v53 }
 0x10c   : > { %v721_v4 = vld [vmem:[#allocation2] sm:$0xff] }
 0x10e   : > { %v3084_v5 = vld [vmem:[#allocation2 + $0x8] sm:$0xff]  ;;  %v723_v8 = vld [vmem:[#allocation2 + $0x10] sm:$0x11] }
 0x10f   : > { %v3086_v9 = vld [vmem:[#allocation3] ss:$8 sps:$4 sm:$0xff]   ;;  %v2137_v13 = vcombine.high %v721_v4, %v3084_v5  ;;  %v3089_v15 = vcombine.high %v723_v8, %v723_v8  ;;  %v2136_v33 = vcombine.low %v721_v4, %v3084_v5  ;;  %v3092_v34 = vcombine.low %v723_v8, %v723_v8  ;;  %v3094_v36 = vld [vmem:[#allocation3 + $0x10] sm:$0x11] }
 0x110   : > { %1043 = vmatmul.mubr.bf16.vlgmr.msra.gmra.mrb[4].mxu0 %v3086_v9  ;;  %v2175_v42 = vcombine.high %v3094_v36, %v3094_v36  ;;  %v3106_v4 = vld [vmem:[%s3493_s4 + $0x100] sm:$0xff]  }
 0x111   : > { %v756_v39 = vshll.u32 %v2137_v13, 16  ;;  %v761_v41 = vshll.u32 %v3089_v15, 16  ;;  %v744_v44 = vshll.u32 %v2136_v33, 16  ;;  %v749_v45 = vshll.u32 %v3092_v34, 16  ;;  %2341 = vmatpush3.bf16.msra.mxu0 %v2859_v26 }
 0x112   : > { %v754_v48 = vshrl.u32 %v2137_v13, 16  ;;  %2342 = vmatprep.subr.bf16.mxu0 %v2888_v35  ;;  %v742_v55 = vshrl.u32 %v2136_v33, 16  ;;  %v1076_v61 = vshll.u32 %v2175_v42, 16  ;;  %v3115_v35 = vld [vmem:[%s3493_s4 + $0x148] sm:$0xff]   ;;  %v2660_v33 = vld [vmem:[%s3493_s4 + $0x150] sm:$0xff]   ;;  %v1057_v42 = vshrl.u32 %v3086_v9, 16 }
 0x113   : > { %v758_v49 = vrot.slane %v756_v39, 1  ;;  %v746_v56 = vrot.slane %v744_v44, 1  ;;  %v763_v63 = vrot.slane %v761_v41, 1  ;;  %v751_v3 = vrot.slane %v749_v45, 1  ;;  %v1303_v44 = vld [vmem:[#allocation2] sm:$0xee] }
 0x114   : > { %v1078_v26 = vrot.slane %v1076_v61, 1  ;;  %v1059_v39 = vshll.u32 %v3086_v9, 16  ;;  %v2193_v45 = vcombine.high %v1303_v44, %v3084_v5  ;;  %v1314_v54 = vrot.slane %v3089_v15, 1  ;;  %v2673_v15 = vld [vmem:[%s3493_s4 + $0x138] sm:$0xff]   ;;  %v3307_v61 = vld [vmem:[%s3495_s6 + $0x20] sm:$0xff]  }
 0x115   : > { %v759_v62 = vor.u32 %v758_v49, %v754_v48  ;;  %v747_v1 = vor.u32 %v746_v56, %v742_v55  ;;  %2343 = vmatpush3.bf16.msra.mxu0 %v2899_v40  ;;  %v2659_v40 = vld [vmem:[%s3493_s4 + $0x108] sm:$0xff]   ;;  %v2669_v49 = vld [vmem:[%s3493_s4 + $0x130] sm:$0xff]   ;;  %v3300_v56 = vld [vmem:[%s3495_s6 + $0x18] sm:$0xff]  }
 0x116   : > { %v1079_v13 = vsel %vm740_vm0, %v1074_v0, %v1078_v26  ;;  %2344 = vmatprep.subr.bf16.mxu0 %v2920_v47  ;;  %v2661_v47 = vld [vmem:[%s3493_s4 + $0x110] sm:$0xff]   ;;  %v1313_v53 = vrot.slane %v2193_v45, 1  ;;  %v3327_v0 = vld [vmem:[%s3495_s6 + $0x38] sm:$0xff]  }
 0x117   : > { %v3110_v8 = vsel %vm740_vm0, %v759_v62, %v763_v63  ;;  %v3119_v11 = vsel %vm740_vm0, %v747_v1, %v751_v3  ;;  %1253 = vmatprep.mubr.bf16.mxu0 %v1079_v13  ;;  %v3291_v55 = vld [vmem:[%s3495_s6 + $0x10] sm:$0xff]   ;;  %v3314_v62 = vld [vmem:[%s3495_s6 + $0x28] sm:$0xff]  }
 0x118   : > { %895 = vmatprep.mubr.bf16.mxu1 %v3110_v8  ;;  %v1315_v9 = vsel %vm1309_vm1, %v1313_v53, %v1314_v54  ;;  %v3320_v63 = vld [vmem:[%s3495_s6 + $0x30] sm:$0xff]  }
 0x119   : > { %896 = vmatmul.mubr.bf16.vlgmr.msra.gmra.mrb[0].mxu1 %v3119_v11  ;;  %2345 = vmatpush3.bf16.msra.mxu0 %v2926_v50  ;;  %v2662_v50 = vld [vmem:[%s3493_s4 + $0x158] sm:$0xff]  }
 0x11a   : > { %2319 = vmatpush3.bf16.msra.mxu1 %v3106_v4  ;;  %1210 = vmatprep.mubr.bf16.mxu1 %v1079_v13 }
 0x11b   : > { %2320 = vmatprep.subr.bf16.mxu1 %v3115_v35  ;;  %2346 = vmatprep.subr.bf16.mxu0 %v2946_v57  ;;  %v2664_v57 = vld [vmem:[%s3493_s4 + $0x160] sm:$0xff]  }
 0x11d   : > { %2347 = vmatpush3.bf16.msra.mxu0 %v2956_v59  ;;  %v2174_v59 = vcombine.low %v3094_v36, %v3094_v36  ;;  %v2667_v36 = vld [vmem:[%s3493_s4 + $0x128] sm:$0xff]  }
 0x11e   : > { %2321 = vmatpush3.bf16.msra.mxu1 %v2659_v40  ;;  %2348 = vmatprep.subr.bf16.mxu0 %v2988_v7  ;;  %v2665_v7 = vld [vmem:[%s3493_s4 + $0x120] sm:$0xff]  }
 0x11f   : > { %2322 = vmatprep.subr.bf16.mxu1 %v2660_v33  ;;  %v1064_v41 = vshll.u32 %v2174_v59, 16 }
 0x121   : > { %2349 = vmatpush3.bf16.msra.mxu0 %v2993_v10  ;;  %v2666_v10 = vld [vmem:[%s3493_s4 + $0x168] sm:$0xff]   ;;  %v1066_v48 = vrot.slane %v1064_v41, 1 }
 0x122   : > { %2323 = vmatpush3.bf16.msra.mxu1 %v2661_v47  ;;  %2350 = vmatprep.subr.bf16.mxu0 %v3014_v17  ;;  %v1061_v17 = vrot.slane %v1059_v39, 1 }
 0x123   : > { %2324 = vmatprep.subr.bf16.mxu1 %v2662_v50 }
 0x125   : > { %2351 = vmatpush3.bf16.msra.mxu0 %v3021_v19  ;;  %v2668_v19 = vld [vmem:[%s3493_s4 + $0x170] sm:$0xff]  }
 0x126   : > { %2325 = vmatpush3.bf16.msra.mxu1 %v2663_v38  ;;  %2352 = vmatprep.subr.bf16.mxu0 %v3032_v24  ;;  %v1062_v24 = vor.u32 %v1061_v17, %v1057_v42  ;;  %v3339_v42 = vld [vmem:[%s3494_s5] ss:$0 sm:$0xff] }
 0x127   : > { %2326 = vmatprep.subr.bf16.mxu1 %v2664_v57 }
 0x129   : > { %2353 = vmatpush3.bf16.msra.mxu0 %v3045_v28  ;;  %v2672_v28 = vld [vmem:[%s3493_s4 + $0x178] sm:$0xff]  }
 0x12a   : > { %2327 = vmatpush3.bf16.msra.mxu1 %v2665_v7  ;;  %2354 = vmatprep.subr.bf16.mxu0 %v3054_v29  ;;  %v1067_v29 = vsel %vm740_vm0, %v1062_v24, %v1066_v48 }
 0x12b   : > { %2328 = vmatprep.subr.bf16.mxu1 %v2666_v10 }
 0x12d   : > { %2355 = vmatpush3.bf16.msra.mxu0 %v3059_v30  ;;  %v3272_v30 = vld [vmem:[%s3495_s6 + $0x78] sm:$0xff]  }
 0x12e   : > { %2329 = vmatpush3.bf16.msra.mxu1 %v2667_v36  ;;  %2384 = vmatprep.subr.bf16.mxu0 %v3066_v12  ;;  %v3278_v12 = vld [vmem:[%s3495_s6 + $0x8] sm:$0xff]  }
 0x12f   : > { %2330 = vmatprep.subr.bf16.mxu1 %v2668_v19 }
 0x130   : > { %1254 = vmatmul.mubr.bf16.vlgmr.msra.gmra.mrb[8].mxu0 %v1067_v29 }
 0x131   : > { %2385 = vmatpush3.bf16.msra.mxu0 %v3106_v4  ;;  %1350 = vmatprep.mubr.bf16.mxu0 %v1315_v9 }
 0x132   : > { %2331 = vmatpush3.bf16.msra.mxu1 %v2669_v49  ;;  %2386 = vmatprep.subr.bf16.mxu0 %v3115_v35 }
 0x133   : > { %2332 = vmatprep.subr.bf16.mxu1 %v2672_v28 }
 0x135   : > { %2387 = vmatpush3.bf16.msra.mxu0 %v2659_v40 }
 0x136   : > { %2333 = vmatpush3.bf16.msra.mxu1 %v2673_v15  ;;  %2388 = vmatprep.subr.bf16.mxu0 %v2660_v33 }
 0x137   : > { %2362 = vmatprep.subr.bf16.mxu1 %v2831_v18  ;;  %v2192_v18 = vcombine.low %v1303_v44, %v3084_v5  ;;  %v1381_v5 = vld [vmem:[#allocation5] sm:$0x1] }
 0x139   : > { %1211 = vmatmul.mubr.bf16.vlgmr.msra.gmra.mrb[4].mxu1 %v1067_v29  ;;  %2389 = vmatpush3.bf16.msra.mxu0 %v2661_v47 }
 0x13a   : > { %2363 = vmatpush3.bf16.msra.mxu1 %v2836_v20  ;;  %1294 = vmatprep.mubr.bf16.mxu1 %v3110_v8  ;;  %v1310_v20 = vrot.slane %v2192_v18, 1 }
 0x13b   : > { %2364 = vmatprep.subr.bf16.mxu1 %v2841_v21  ;;  %2390 = vmatprep.subr.bf16.mxu0 %v2662_v50  ;;  %v1311_v21 = vrot.slane %v3092_v34, 1  ;;  %v1382_v34 = vsel %vm2870_vm4, 0, %v1381_v5 }
 0x13c   : > { %1383 = vst [vmem:[#allocation5] sm:$0x1] %v1382_v34 }
 0x13d   : > { %2391 = vmatpush3.bf16.msra.mxu0 %v2663_v38 }
 0x13e   : > { %2365 = vmatpush3.bf16.msra.mxu1 %v2847_v22  ;;  %2392 = vmatprep.subr.bf16.mxu0 %v2664_v57  ;;  %v1312_v22 = vsel %vm1309_vm1, %v1310_v20, %v1311_v21 }
 0x13f   : > { %2366 = vmatprep.subr.bf16.mxu1 %v2864_v27  ;;  %v1375_v27 = vld [vmem:[#allocation4] sm:$0x1] }
 0x141   : > { %2393 = vmatpush3.bf16.msra.mxu0 %v2665_v7 }
 0x142   : > { %2367 = vmatpush3.bf16.msra.mxu1 %v2879_v32  ;;  %2394 = vmatprep.subr.bf16.mxu0 %v2666_v10  ;;  %v1376_v32 = vsel %vm2870_vm4, 0, %v1375_v27 }
 0x143   : > { %2368 = vmatprep.subr.bf16.mxu1 %v2906_v43  ;;  %1377 = vst [vmem:[#allocation4] sm:$0x1] %v1376_v32  ;;  %v3213_v43 = vld [vmem:[%s3495_s6 + $0x40] sm:$0xff]  }
 0x145   : > { %2395 = vmatpush3.bf16.msra.mxu0 %v2667_v36 }
 0x146   : > { %2369 = vmatpush3.bf16.msra.mxu1 %v2915_v46  ;;  %2396 = vmatprep.subr.bf16.mxu0 %v2668_v19  ;;  %v2713_v46 = vmov 0.0  }
 0x147   : > { %2370 = vmatprep.subr.bf16.mxu1 %v2931_v51  ;;  %v3222_v51 = vld [vmem:[%s3495_s6 + $0x48] sm:$0xff]  }
 0x149   : > { %2397 = vmatpush3.bf16.msra.mxu0 %v2669_v49 }
 0x14a   : > { %2371 = vmatpush3.bf16.msra.mxu1 %v2938_v52  ;;  %2398 = vmatprep.subr.bf16.mxu0 %v2672_v28  ;;  %v1378_v52 = vld [vmem:[#allocation4 + $0x8] sm:$0x1]  ;;  %v1413_v32 = vld [vmem:[#allocation4] sm:$0xf] }
 0x14b   : > { %2372 = vmatprep.subr.bf16.mxu1 %v2961_v60  ;;  %v1379_v60 = vsel %vm2892_vm9, 0, %v1378_v52 }
 0x14c   : > { %1380 = vst [vmem:[#allocation4 + $0x8] sm:$0x1] %v1379_v60 }
 0x14d   : > { %2399 = vmatpush3.bf16.msra.mxu0 %v2673_v15 }
 0x14e   : > { %2373 = vmatpush3.bf16.msra.mxu1 %v2983_v6  ;;  %2480 = vmatprep.subr.bf16.mxu0 %v2713_v46  ;;  %v3231_v6 = vld [vmem:[%s3495_s6 + $0x50] sm:$0xff]  }
 0x14f   : > { %2374 = vmatprep.subr.bf16.mxu1 %v3002_v14  ;;  %v3237_v14 = vld [vmem:[%s3495_s6 + $0x58] sm:$0xff]  }
 0x150   : > { %1351 = vmatmul.mubr.bf16.vlgmr.msra.gmra.mrb[12].mxu0 %v1312_v22 }
 0x151   : > { %2496 = vmatprep.mubr.msk.bf16.mxu0 %vm2714_vm2, %v2713_v46 }
 0x152   : > { %2375 = vmatpush3.bf16.msra.mxu1 %v3009_v16  ;;  %v3251_v16 = vld [vmem:[%s3495_s6 + $0x68] sm:$0xff]  }
 0x153   : > { %2376 = vmatprep.subr.bf16.mxu1 %v3026_v23  ;;  %v3258_v23 = vld [vmem:[%s3495_s6 + $0x70] sm:$0xff]   ;;  %v1417_v34 = vld [vmem:[#allocation4 + $0x8] sm:$0x1] }
 0x156   : > { %2377 = vmatpush3.bf16.msra.mxu1 %v3038_v25  ;;  %v3264_v25 = vld [vmem:[%s3495_s6] sm:$0xff]  }
 0x157   : > { %2460 = vmatprep.subr.bf16.mxu1 %v2713_v46  ;;  %2481 = vmatpush3.bf16.msra.mxu0 %v3264_v25 }
 0x158   : > { %2482 = vmatprep.subr.bf16.mxu0 %v2713_v46 }
 0x159   : > { %1295 = vmatmul.mubr.bf16.vlgmr.msra.gmra.mrb[8].mxu1 %v3119_v11 }
 0x15a   : > { %2461 = vmatpush3.bf16.msra.mxu1 %v3213_v43  ;;  %2476 = vmatprep.mubr.msk.bf16.mxu1 %vm2714_vm2, %v2713_v46 }
 0x15b   : > { %2462 = vmatprep.subr.bf16.mxu1 %v2713_v46  ;;  %2483 = vmatpush3.bf16.msra.mxu0 %v3278_v12 }
 0x15c   : > { %2484 = vmatprep.subr.bf16.mxu0 %v2713_v46 }
 0x15e   : > { %2463 = vmatpush3.bf16.msra.mxu1 %v3222_v51 }
 0x15f   : > { %2464 = vmatprep.subr.bf16.mxu1 %v2713_v46  ;;  %2485 = vmatpush3.bf16.msra.mxu0 %v3291_v55 }
 0x160   : > { %2486 = vmatprep.subr.bf16.mxu0 %v2713_v46 }
 0x162   : > { %2465 = vmatpush3.bf16.msra.mxu1 %v3231_v6 }
 0x163   : > { %2466 = vmatprep.subr.bf16.mxu1 %v2713_v46  ;;  %2487 = vmatpush3.bf16.msra.mxu0 %v3300_v56 }
 0x164   : > { %2488 = vmatprep.subr.bf16.mxu0 %v2713_v46 }
 0x166   : > { %2467 = vmatpush3.bf16.msra.mxu1 %v3237_v14 }
 0x167   : > { %2468 = vmatprep.subr.bf16.mxu1 %v2713_v46  ;;  %2489 = vmatpush3.bf16.msra.mxu0 %v3307_v61 }
 0x168   : > { %2490 = vmatprep.subr.bf16.mxu0 %v2713_v46 }
 0x16a   : > { %2469 = vmatpush3.bf16.msra.mxu1 %v3244_v37 }
 0x16b   : > { %2470 = vmatprep.subr.bf16.mxu1 %v2713_v46  ;;  %2491 = vmatpush3.bf16.msra.mxu0 %v3314_v62 }
 0x16c   : > { %2492 = vmatprep.subr.bf16.mxu0 %v2713_v46 }
 0x16e   : > { %2471 = vmatpush3.bf16.msra.mxu1 %v3251_v16 }
 0x16f   : > { %2472 = vmatprep.subr.bf16.mxu1 %v2713_v46  ;;  %2493 = vmatpush3.bf16.msra.mxu0 %v3320_v63 }
 0x170   : > { %2494 = vmatprep.subr.bf16.mxu0 %v2713_v46 }
 0x172   : > { %2473 = vmatpush3.bf16.msra.mxu1 %v3258_v23 }
 0x173   : > { %2474 = vmatprep.subr.bf16.mxu1 %v2713_v46  ;;  %2495 = vmatpush3.bf16.msra.mxu0 %v3327_v0 }
 0x174   : > { %2520 = vmatprep.subr.bf16.mxu0 %v2713_v46 }
 0x176   : > { %2475 = vmatpush3.bf16.msra.mxu1 %v3272_v30 }
 0x177   : > { %2500 = vmatprep.subr.bf16.mxu1 %v2713_v46 }
 0x1e3   : > { %v2312_v1 = vpop.f32.mrb[4].mxu0 }
 0x1e4   : > { %v2313_v3 = vpop.f32.mrb[5].mxu0 }
 0x1e5   : > { %v2314_v4 = vadd.f32 %v2313_v3, %v2312_v1  ;;  %v2315_v26 = vpop.f32.mrb[6].mxu0 }
 0x1e6   : > { %v2316_v8 = vpop.f32.mrb[7].mxu0 }
 0x1e7   : > { %v2317_v35 = vadd.f32 %v2316_v8, %v2315_v26 }
 0x1ec   : > { %v2290_v11 = vpop.f32.mrb[0].mxu1 }
 0x1ed   : > { %v2291_v13 = vpop.f32.mrb[1].mxu1 }
 0x1ee   : > { %v2292_v40 = vadd.f32 %v2291_v13, %v2290_v11  ;;  %v2293_v33 = vpop.f32.mrb[2].mxu1 }
 0x1ef   : > { %v2294_v47 = vpop.f32.mrb[3].mxu1 }
 0x1f0   : > { %v1045_v50 = vadd.f32 %v2314_v4, %v2292_v40  ;;  %v2295_v38 = vadd.f32 %v2294_v47, %v2293_v33 }
 0x1f2   : > { %v1048_v57 = vadd.f32 %v2317_v35, %v2295_v38 }
 0x203   : > { %v2356_v59 = vpop.f32.mrb[8].mxu0 }
 0x204   : > { %v2357_v39 = vpop.f32.mrb[9].mxu0 }
 0x205   : > { %v3332_v7 = vadd.f32 %v2357_v39, %v2356_v59  ;;  %v2359_v10 = vpop.f32.mrb[10].mxu0 }
 0x206   : > { %v2360_v17 = vpop.f32.mrb[11].mxu0 }
 0x207   : > { %v3334_v41 = vadd.f32 %v2360_v17, %v2359_v10 }
 0x20c   : > { %v2334_v44 = vpop.f32.mrb[4].mxu1 }
 0x20d   : > { %v2335_v36 = vpop.f32.mrb[5].mxu1 }
 0x20e   : > { %v2336_v45 = vadd.f32 %v2335_v36, %v2334_v44  ;;  %v2337_v19 = vpop.f32.mrb[6].mxu1 }
 0x20f   : > { %v2338_v24 = vpop.f32.mrb[7].mxu1 }
 0x210   : > { %v1219_v48 = vadd.f32 %v2336_v45, %v1045_v50  ;;  %v2339_v49 = vadd.f32 %v2338_v24, %v2337_v19 }
 0x212   : > { %v1367_v53 = vadd.f32 %v3339_v42, %v1219_v48  ;;  %v1220_v54 = vadd.f32 %v2339_v49, %v1048_v57 }
 0x214   : > { %v1369_v28 = vmax.f32 %v1367_v53, 0.0  ;;  %v1368_v29 = vadd.f32 %v3339_v42, %v1220_v54 }
 0x216   : > { %v2270_v9 = vpack.c.bf16 %v1369_v28, %v1369_v28  ;;  %v1370_v15 = vmax.f32 %v1368_v29, 0.0 }
 0x218   : > { %v1394_v18 = vshrl.u32 %v2270_v9, 16  ;;  %v2271_v20 = vpack.c.bf16 %v1370_v15, %v1370_v15  ;;  %v1397_v22 = vshll.u32 %v2270_v9, 16 }
 0x21a   : > { %v1396_v21 = vrot.slane %v1394_v18, 7  ;;  %v1402_v27 = vshrl.u32 %v2271_v20, 16  ;;  %v1405_v5 = vshll.u32 %v2271_v20, 16  ;;  %v3355_v20 = vld [vmem:[%s3495_s6 + $0x80] sm:$0xff]  }
 0x21c   : > { %v1399_v52 = vor.u32 %v1397_v22, %v1396_v21  ;;  %v1404_v60 = vrot.slane %v1402_v27, 7  ;;  %v1400_v1 = vrot.slane %v1396_v21, 4 }
 0x21e   : > { %v1414_v3 = vsel %vm2949_vm13, %v1399_v52, %v1413_v32  ;;  %v1407_v4 = vor.u32 %v1405_v5, %v1404_v60  ;;  %v1409_v26 = vrot.slane %v1404_v60, 4  ;;  %v3367_v60 = vld [vmem:[%s3495_s6 + $0x88] sm:$0xff]  }
 0x21f   : > { %1415 = vst [vmem:[#allocation4] sm:$0xf] %v1414_v3 }
 0x220   : > { %v1408_v8 = vsel %vm2968_vm15, %v1400_v1, %v1407_v4  ;;  %v1418_v35 = vsel %vm2870_vm4, %v1409_v26, %v1417_v34  ;;  %v3378_v1 = vld [vmem:[%s3495_s6 + $0x90] sm:$0xff]  }
 0x221   : > { %1416 = vst [vmem:[#allocation4 + $0x4] sm:$0xf] %v1408_v8  ;;  %1419 = vst [vmem:[#allocation4 + $0x8] sm:$0x1] %v1418_v35  ;;  %v3385_v35 = vld [vmem:[%s3495_s6 + $0x98] sm:$0xff]  }
 0x223   : > { %v2400_v11 = vpop.f32.mrb[12].mxu0 }
 0x224   : > { %v2401_v13 = vpop.f32.mrb[13].mxu0 }
 0x225   : > { %v2402_v40 = vadd.f32 %v2401_v13, %v2400_v11  ;;  %v2403_v33 = vpop.f32.mrb[14].mxu0 }
 0x226   : > { %v1504_v47 = vld [vmem:[#allocation4] sm:$0xf]  ;;  %v2404_v38 = vpop.f32.mrb[15].mxu0 }
 0x227   : > { %v1904_v50 = vld [vmem:[#allocation4] sm:$0xe]  ;;  %v2405_v59 = vadd.f32 %v2404_v38, %v2403_v33  ;;  %v1450_v38 = vld [vmem:[#allocation5 + $0x8] sm:$0x1] }
 0x228   : > { %v1505_v57 = vld [vmem:[#allocation4 + $0x4] sm:$0xf]  ;;  %v2686_v10 = vld [vmem:[#allocation4 + $0x8] ss:$0 sps:$4 sm:$0x11]  }
 0x229   : > { %v2231_v39 = vcombine.low %v1504_v47, %v1505_v57  ;;  %v2259_v17 = vcombine.low %v1904_v50, %v1505_v57  ;;  %v1526_v36 = vshll.u32 %v2686_v10, 16  ;;  %v1909_v24 = vrot.slane %v2686_v10, 1  ;;  %v3392_v57 = vld [vmem:[%s3495_s6 + $0xa0] sm:$0xff]  }
 0x22b   : > { %v1521_v44 = vshll.u32 %v2231_v39, 16  ;;  %v1908_v45 = vrot.slane %v2259_v17, 1  ;;  %v1519_v49 = vshrl.u32 %v2231_v39, 16  ;;  %v1528_v18 = vrot.slane %v1526_v36, 1 }
 0x22c   : > { %v2378_v19 = vpop.f32.mrb[8].mxu1 }
 0x22d   : > { %v2379_v48 = vpop.f32.mrb[9].mxu1  ;;  %v1523_v53 = vrot.slane %v1521_v44, 1  ;;  %v3350_v29 = vsel %vm1309_vm1, %v1908_v45, %v1909_v24  ;;  %v3419_v45 = vld [vmem:[%s3495_s6 + $0xb8] sm:$0xff]  }
 0x22e   : > { %v2380_v54 = vadd.f32 %v2379_v48, %v2378_v19  ;;  %v2381_v28 = vpop.f32.mrb[10].mxu1 }
 0x22f   : > { %v2382_v9 = vpop.f32.mrb[11].mxu1  ;;  %v1524_v15 = vor.u32 %v1523_v53, %v1519_v49 }
 0x230   : > { %v1297_v21 = vadd.f32 %v2380_v54, %v3332_v7  ;;  %v2383_v22 = vadd.f32 %v2382_v9, %v2381_v28 }
 0x231   : > { %v3359_v27 = vsel %vm740_vm0, %v1524_v15, %v1528_v18 }
 0x232   : > { %v1359_v32 = vadd.f32 %v2402_v40, %v1297_v21  ;;  %v1300_v52 = vadd.f32 %v2383_v22, %v3334_v41  ;;  %2477 = vmatmul.mubr.bf16.vlgmr.msra.gmra.mrb[12].mxu1 %v3359_v27  ;;  %v1446_v40 = vld [vmem:[#allocation5] sm:$0xf] }
 0x233   : > { %2501 = vmatpush3.bf16.msra.mxu1 %v3355_v20  ;;  %2516 = vmatprep.mubr.msk.bf16.mxu1 %vm2714_vm2, %v2713_v46 }
 0x234   : > { %v1371_v7 = vadd.f32 %v3339_v42, %v1359_v32  ;;  %v1360_v5 = vadd.f32 %v2405_v59, %v1300_v52  ;;  %2502 = vmatprep.subr.bf16.mxu1 %v2713_v46 }
 0x236   : > { %v1373_v34 = vmax.f32 %v1371_v7, 0.0  ;;  %v1372_v41 = vadd.f32 %v3339_v42, %v1360_v5 }
 0x237   : > { %2503 = vmatpush3.bf16.msra.mxu1 %v3367_v60 }
 0x238   : > { %v2272_v3 = vpack.c.bf16 %v1373_v34, %v1373_v34  ;;  %v1374_v4 = vmax.f32 %v1372_v41, 0.0  ;;  %2504 = vmatprep.subr.bf16.mxu1 %v2713_v46 }
 0x23a   : > { %v1427_v26 = vshrl.u32 %v2272_v3, 16  ;;  %v2273_v8 = vpack.c.bf16 %v1374_v4, %v1374_v4  ;;  %v1430_v11 = vshll.u32 %v2272_v3, 16 }
 0x23b   : > { %2505 = vmatpush3.bf16.msra.mxu1 %v3378_v1 }
 0x23c   : > { %v1429_v42 = vrot.slane %v1427_v26, 7  ;;  %v1435_v13 = vshrl.u32 %v2273_v8, 16  ;;  %2506 = vmatprep.subr.bf16.mxu1 %v2713_v46  ;;  %v1438_v50 = vshll.u32 %v2273_v8, 16 }
 0x23e   : > { %v1432_v33 = vor.u32 %v1430_v11, %v1429_v42  ;;  %v1437_v47 = vrot.slane %v1435_v13, 7  ;;  %v1433_v59 = vrot.slane %v1429_v42, 4 }
 0x23f   : > { %2507 = vmatpush3.bf16.msra.mxu1 %v3385_v35 }
 0x240   : > { %v1447_v39 = vsel %vm2949_vm13, %v1432_v33, %v1446_v40  ;;  %v1440_v10 = vor.u32 %v1438_v50, %v1437_v47  ;;  %v1442_v17 = vrot.slane %v1437_v47, 4  ;;  %2508 = vmatprep.subr.bf16.mxu1 %v2713_v46 }
 0x241   : > { %1448 = vst [vmem:[#allocation5] sm:$0xf] %v1447_v39 }
 0x242   : > { %v1441_v44 = vsel %vm2968_vm15, %v1433_v59, %v1440_v10  ;;  %v1451_v36 = vsel %vm2870_vm4, %v1442_v17, %v1450_v38 }
 0x243   : > { %1449 = vst [vmem:[#allocation5 + $0x4] sm:$0xf] %v1441_v44  ;;  %1452 = vst [vmem:[#allocation5 + $0x8] sm:$0x1] %v1451_v36  ;;  %2509 = vmatpush3.bf16.msra.mxu1 %v3392_v57 }
 0x244   : > { %2510 = vmatprep.subr.bf16.mxu1 %v2713_v46 }
 0x247   : > { %2511 = vmatpush3.bf16.msra.mxu1 %v3405_v58 }
 0x248   : > { %2512 = vmatprep.subr.bf16.mxu1 %v2713_v46 }
 0x24a   : > { %v2700_v31 = vld [vmem:[#allocation5] sm:$0xff]   ;;  %v2702_v19 = vld [vmem:[#allocation5 + $0x8] ss:$0 sps:$4 sm:$0x11]  }
 0x24b   : > { %2513 = vmatpush3.bf16.msra.mxu1 %v3412_v2  ;;  %2497 = vmatmul.mubr.bf16.vlgmr.msra.gmra.mrb[16].mxu0 %v2700_v31  ;;  %v1721_v24 = vshll.u32 %v2700_v31, 16  ;;  %v1726_v48 = vshll.u32 %v2702_v19, 16  ;;  %v1719_v49 = vshrl.u32 %v2700_v31, 16 }
 0x24c   : > { %2514 = vmatprep.subr.bf16.mxu1 %v2713_v46  ;;  %2521 = vmatpush3.bf16.msra.mxu0 %v3213_v43 }
 0x24d   : > { %2536 = vmatprep.mubr.msk.bf16.mxu0 %vm2714_vm2, %v2713_v46  ;;  %2522 = vmatprep.subr.bf16.mxu0 %v2713_v46  ;;  %v1723_v53 = vrot.slane %v1721_v24, 1  ;;  %v1728_v28 = vrot.slane %v1726_v48, 1 }
 0x24f   : > { %2515 = vmatpush3.bf16.msra.mxu1 %v3419_v45  ;;  %v1724_v54 = vor.u32 %v1723_v53, %v1719_v49 }
 0x250   : > { %2540 = vmatprep.subr.bf16.mxu1 %v2713_v46  ;;  %2523 = vmatpush3.bf16.msra.mxu0 %v3222_v51 }
 0x251   : > { %v1729_v9 = vsel %vm740_vm0, %v1724_v54, %v1728_v28  ;;  %2524 = vmatprep.subr.bf16.mxu0 %v2713_v46 }
 0x252   : > { %2517 = vmatmul.mubr.bf16.vlgmr.msra.gmra.mrb[16].mxu1 %v1729_v9 }
 0x253   : > { %2541 = vmatpush3.bf16.msra.mxu1 %v3264_v25  ;;  %2556 = vmatprep.mubr.msk.bf16.mxu1 %vm2714_vm2, %v2713_v46 }
 0x254   : > { %2525 = vmatpush3.bf16.msra.mxu0 %v3231_v6  ;;  %2542 = vmatprep.subr.bf16.mxu1 %v2713_v46 }
 0x255   : > { %2526 = vmatprep.subr.bf16.mxu0 %v2713_v46 }
 0x257   : > { %2543 = vmatpush3.bf16.msra.mxu1 %v3278_v12 }
 0x258   : > { %2527 = vmatpush3.bf16.msra.mxu0 %v3237_v14  ;;  %2544 = vmatprep.subr.bf16.mxu1 %v2713_v46 }
 0x259   : > { %2528 = vmatprep.subr.bf16.mxu0 %v2713_v46 }
 0x25b   : > { %2545 = vmatpush3.bf16.msra.mxu1 %v3291_v55  ;;  %v2260_v55 = vld [vmem:[%s3496_s7] ss:$0 sm:$0xff] }
 0x25c   : > { %2529 = vmatpush3.bf16.msra.mxu0 %v3244_v37  ;;  %2546 = vmatprep.subr.bf16.mxu1 %v2713_v46 }
 0x25d   : > { %2530 = vmatprep.subr.bf16.mxu0 %v2713_v46 }
 0x25f   : > { %2547 = vmatpush3.bf16.msra.mxu1 %v3300_v56 }
 0x260   : > { %2531 = vmatpush3.bf16.msra.mxu0 %v3251_v16  ;;  %2548 = vmatprep.subr.bf16.mxu1 %v2713_v46 }
 0x261   : > { %2532 = vmatprep.subr.bf16.mxu0 %v2713_v46 }
 0x263   : > { %2549 = vmatpush3.bf16.msra.mxu1 %v3307_v61 }
 0x264   : > { %2533 = vmatpush3.bf16.msra.mxu0 %v3258_v23  ;;  %2550 = vmatprep.subr.bf16.mxu1 %v2713_v46 }
 0x265   : > { %2534 = vmatprep.subr.bf16.mxu0 %v2713_v46 }
 0x267   : > { %2551 = vmatpush3.bf16.msra.mxu1 %v3314_v62 }
 0x268   : > { %2535 = vmatpush3.bf16.msra.mxu0 %v3272_v30  ;;  %2552 = vmatprep.subr.bf16.mxu1 %v2713_v46 }
 0x269   : > { %2560 = vmatprep.subr.bf16.mxu0 %v2713_v46 }
 0x26b   : > { %2537 = vmatmul.mubr.bf16.vlgmr.msra.gmra.mrb[20].mxu0 %v1729_v9  ;;  %2553 = vmatpush3.bf16.msra.mxu1 %v3320_v63 }
 0x26c   : > { %2561 = vmatpush3.bf16.msra.mxu0 %v3355_v20  ;;  %2554 = vmatprep.subr.bf16.mxu1 %v2713_v46 }
 0x26d   : > { %2562 = vmatprep.subr.bf16.mxu0 %v2713_v46  ;;  %2576 = vmatprep.mubr.msk.bf16.mxu0 %vm2714_vm2, %v2713_v46 }
 0x26f   : > { %2555 = vmatpush3.bf16.msra.mxu1 %v3327_v0 }
 0x270   : > { %2563 = vmatpush3.bf16.msra.mxu0 %v3367_v60 }
 0x271   : > { %2564 = vmatprep.subr.bf16.mxu0 %v2713_v46 }
 0x272   : > { %2557 = vmatmul.mubr.bf16.vlgmr.msra.gmra.mrb[20].mxu1 %v3359_v27 }
 0x274   : > { %2565 = vmatpush3.bf16.msra.mxu0 %v3378_v1 }
 0x275   : > { %2566 = vmatprep.subr.bf16.mxu0 %v2713_v46 }
 0x278   : > { %2567 = vmatpush3.bf16.msra.mxu0 %v3385_v35 }
 0x279   : > { %2568 = vmatprep.subr.bf16.mxu0 %v2713_v46 }
 0x27c   : > { %2569 = vmatpush3.bf16.msra.mxu0 %v3392_v57 }
 0x27d   : > { %2570 = vmatprep.subr.bf16.mxu0 %v2713_v46 }
 0x280   : > { %2571 = vmatpush3.bf16.msra.mxu0 %v3405_v58 }
 0x281   : > { %2572 = vmatprep.subr.bf16.mxu0 %v2713_v46 }
 0x284   : > { %2573 = vmatpush3.bf16.msra.mxu0 %v3412_v2 }
 0x285   : > { %2574 = vmatprep.subr.bf16.mxu0 %v2713_v46 }
 0x288   : > { %2575 = vmatpush3.bf16.msra.mxu0 %v3419_v45 }
 0x28b   : > { %2577 = vmatmul.mubr.bf16.vlgmr.msra.gmra.mrb[24].mxu0 %v3350_v29 }
 0x305   : > { %v1613_v43 = vpop.f32.mrb[12].mxu1 }
 0x306   : > { %v2478_v51 = vpop.f32.mrb[13].mxu1 }
 0x307   : > { %v1616_v6 = vpop.f32.mrb[14].mxu1 }
 0x308   : > { %v2479_v14 = vpop.f32.mrb[15].mxu1 }
 0x31e   : > { %v1708_v37 = vpop.f32.mrb[16].mxu0 }
 0x31f   : > { %v1709_v16 = vadd.f32 %v1708_v37, %v1613_v43  ;;  %v2498_v23 = vpop.f32.mrb[17].mxu0 }
 0x320   : > { %v1711_v25 = vpop.f32.mrb[18].mxu0 }
 0x321   : > { %v1712_v30 = vadd.f32 %v1711_v25, %v1616_v6  ;;  %v2499_v12 = vpop.f32.mrb[19].mxu0 }
 0x325   : > { %v1813_v56 = vpop.f32.mrb[16].mxu1 }
 0x326   : > { %v1820_v46 = vadd.f32 %v1813_v56, %v1709_v16  ;;  %v2518_v61 = vpop.f32.mrb[17].mxu1 }
 0x327   : > { %v1816_v62 = vpop.f32.mrb[18].mxu1 }
 0x328   : > { %v1961_v63 = vadd.f32 %v2260_v55, %v1820_v46  ;;  %v1821_v0 = vadd.f32 %v1816_v62, %v1712_v30  ;;  %v2519_v29 = vpop.f32.mrb[19].mxu1 }
 0x32a   : > { %v1963_v15 = vmax.f32 %v1961_v63, 0.0  ;;  %v1962_v18 = vadd.f32 %v2260_v55, %v1821_v0 }
 0x32c   : > { %1969 = vst [vmem:[%s325_s20] sm:$0xff] %v1963_v15  ;;  %v1964_v20 = vmax.f32 %v1962_v18, 0.0 }
 0x32e   : > { %1970 = vst [vmem:[%s325_s20 + $0x8] sm:$0xff] %v1964_v20 }
 0x33e   : > { %v1856_v21 = vpop.f32.mrb[20].mxu0 }
 0x33f   : > { %v2538_v22 = vpop.f32.mrb[21].mxu0 }
 0x340   : > { %v1859_v27 = vpop.f32.mrb[22].mxu0 }
 0x341   : > { %v2539_v32 = vpop.f32.mrb[23].mxu0 }
 0x345   : > { %v1897_v52 = vpop.f32.mrb[20].mxu1 }
 0x346   : > { %v1898_v60 = vadd.f32 %v1897_v52, %v1856_v21  ;;  %v2558_v7 = vpop.f32.mrb[21].mxu1 }
 0x347   : > { %v1900_v5 = vpop.f32.mrb[22].mxu1 }
 0x348   : > { %v1901_v34 = vadd.f32 %v1900_v5, %v1859_v27  ;;  %v2559_v41 = vpop.f32.mrb[23].mxu1 }
 0x35e   : > { %v1946_v1 = vpop.f32.mrb[24].mxu0 }
 0x35f   : > { %v1953_v3 = vadd.f32 %v1946_v1, %v1898_v60  ;;  %v2578_v4 = vpop.f32.mrb[25].mxu0 }
 0x360   : > { %v1949_v26 = vpop.f32.mrb[26].mxu0 }
 0x361   : > { %v1965_v8 = vadd.f32 %v2260_v55, %v1953_v3  ;;  %v1954_v35 = vadd.f32 %v1949_v26, %v1901_v34  ;;  %v2579_v42 = vpop.f32.mrb[27].mxu0 }
 0x363   : > { %v1967_v11 = vmax.f32 %v1965_v8, 0.0  ;;  %v1966_v13 = vadd.f32 %v2260_v55, %v1954_v35 }
 0x365   : > { %1971 = vst [vmem:[%s325_s20 + $0x10] sm:$0xff] %v1967_v11  ;;  %v1968_v40 = vmax.f32 %v1966_v13, 0.0 }
 0x367   : > { %1972 = vst [vmem:[%s325_s20 + $0x18] sm:$0xff] %v1968_v40 }
 0x368 PF: > { %s18_s27 = sadd.s32 1, %s2710_s27  }
 0x369   : > { %p15_p4 = scmp.ge.s32.totalorder %s18_s27, 4  }
 0x36b   :  { %17 = sbr.rel (!%p15_p4) target bundleno = 1 (0x1), region = 89 }

</bundles_post_ra>
